<compile_context>
chip_gen: v7x
topology: tpu7x:2x2x1
jax: 0.10.0
libtpu: 0.0.40
codegen_flags: <defaults>
</compile_context>

<pallas_src>
import math
import functools

import jax
import jax.numpy as jnp
from jax.experimental import pallas as pl
from jax.experimental.pallas import tpu as pltpu


# --------------------------------------------------------------------------- fused kernel
def _fused_attention_conv_kernel(gap_ref, pair_ref, kv_ref, ks_ref, x_ref, b_ref,
                                 o_ref, *, cout, cin, ksh, ksw, wp, span, factor):
    # gap_ref : (1, 1, V)      per-batch GAP->fc attention vector (computed on host)
    # pair_ref: (Cout*Cin, V)  batch-independent input_vectors * output_vectors (flattened)
    # kv_ref  : (V, K)         kernel_vectors
    # ks_ref  : (K, KH*KW)     kernel_set, taps flattened
    # x_ref   : (1, Cin, Hp*Wp)  zero-padded input image, rows flattened, bf16
    # b_ref   : (Cout, 1)      bias
    # o_ref   : (1, Cout, span)  conv output on the flat (padded-width) index grid

    # ---- dynamic kernel generation: one batched matmul chain over all Cout*Cin rows ----
    bav = pair_ref[...] * gap_ref[0]                                      # (Cout*Cin, V)
    logits = factor * jnp.dot(bav, kv_ref[...],
                              preferred_element_type=jnp.float32)         # (Cout*Cin, K)
    logits = logits - jnp.max(logits, axis=-1, keepdims=True)
    e = jnp.exp(logits)
    p = e * pl.reciprocal(jnp.sum(e, axis=-1, keepdims=True), approx=True)
    w_flat = jnp.dot(p, ks_ref[...], preferred_element_type=jnp.float32)  # (Cout*Cin, KH*KW)
    w3 = w_flat.reshape(cout, cin, ksh * ksw)                             # (Cout, Cin, KH*KW)

    # ---- direct convolution: KH*KW shifted matmuls on the flat padded image ----
    acc = jnp.zeros((cout, span), jnp.float32)
    for r in range(ksh):
        for c in range(ksw):
            off = r * wp + c
            xs = x_ref[0, :, off:off + span]                              # (Cin, span) bf16
            wtap = w3[:, :, r * ksw + c].astype(xs.dtype)                 # (Cout, Cin) bf16
            acc = acc + jnp.dot(wtap, xs, preferred_element_type=jnp.float32)
    o_ref[0] = acc + b_ref[...]


# --------------------------------------------------------------------------- wrapper
def attention_conv2d(params, x, stride=1, padding=0):
    B, Cin, H, W = x.shape
    Cout, V = params["output_vectors"].shape
    K, KH, KW = params["kernel_set"].shape
    s = stride
    Hp, Wp = H + 2 * padding, W + 2 * padding
    Ho = (Hp - KH) // s + 1
    Wo = (Wp - KW) // s + 1
    # flat-output span: covers flat index g = ho*s*Wp + wo*s for all valid (ho, wo)
    span = (Ho - 1) * s * Wp + (Wo - 1) * s + 1
    factor = 1.0 / math.sqrt(V)

    # GAP + fc hoisted out of the kernel: one batched (B,Cin)@(Cin,V) GEMM.
    # (AvgPool over the full map; eval-mode dropout is identity.)
    pooled = jnp.mean(x, axis=(2, 3))                                     # (B, Cin)
    gap = (pooled @ params["fc_w"].T + params["fc_b"]).astype(jnp.float32)
    gap = gap.reshape(B, 1, V)

    # Batch-independent pairwise attention vectors, pre-flattened to (Cout*Cin, V)
    # so the kernel needs no reshape to build bav (row r = co*Cin + ci).
    pair_flat = (jnp.repeat(params["output_vectors"], Cin, axis=0)
                 * jnp.tile(params["input_vectors"], (Cout, 1))).astype(jnp.float32)

    kv = params["kernel_vectors"].astype(jnp.float32)                     # (V, K)
    ks_flat = params["kernel_set"].reshape(K, KH * KW).astype(jnp.float32)
    # TODO(synk): the original PyTorch forward passes a (Cout,)-sized bias to a grouped conv
    # with B*Cout output channels, which errors for B>1; we apply the per-output-channel bias
    # broadcast across the batch (the intended semantics).
    bias2d = params["bias"].reshape(Cout, 1).astype(jnp.float32)

    # Padded input, rows flattened (only 1x activation bytes into the kernel; no im2col).
    xpflat = jnp.pad(x, ((0, 0), (0, 0), (padding, padding), (padding, padding)))
    xpflat = xpflat.reshape(B, Cin, Hp * Wp).astype(jnp.bfloat16)

    kernel = functools.partial(_fused_attention_conv_kernel,
                               cout=Cout, cin=Cin, ksh=KH, ksw=KW,
                               wp=Wp, span=span, factor=factor)

    out_flat = pl.pallas_call(
        kernel,
        out_shape=jax.ShapeDtypeStruct((B, Cout, span), jnp.float32),
        grid_spec=pltpu.PrefetchScalarGridSpec(
            num_scalar_prefetch=0,
            grid=(B,),
            in_specs=[
                pl.BlockSpec((1, 1, V), lambda b: (b, 0, 0)),             # gap
                pl.BlockSpec((Cout * Cin, V), lambda b: (0, 0)),          # pair_flat
                pl.BlockSpec((V, K), lambda b: (0, 0)),                   # kernel_vectors
                pl.BlockSpec((K, KH * KW), lambda b: (0, 0)),             # kernel_set
                pl.BlockSpec((1, Cin, Hp * Wp), lambda b: (b, 0, 0)),     # padded image
                pl.BlockSpec((Cout, 1), lambda b: (0, 0)),                # bias
            ],
            out_specs=pl.BlockSpec((1, Cout, span), lambda b: (b, 0, 0)),
        ),
        compiler_params=pltpu.CompilerParams(dimension_semantics=("parallel",)),
    )(gap, pair_flat, kv, ks_flat, xpflat, bias2d)

    # Un-flatten: valid output sits at flat index ho*s*Wp + wo*s; drop garbage columns.
    rows = (Ho - 1) * s + 1
    pad_amt = rows * Wp - span
    out4 = jnp.pad(out_flat, ((0, 0), (0, 0), (0, pad_amt))).reshape(B, Cout, rows, Wp)
    return out4[:, :, ::s, ::s][:, :, :Ho, :Wo]


# --------------------------------------------------------------------------- pure-JAX reference
def reference_forward(params, x, stride=1, padding=0):
    B, Cin, H, W = x.shape
    Cout, V = params["output_vectors"].shape
    K, KH, KW = params["kernel_set"].shape
    pooled = jnp.mean(x, axis=(2, 3))
    gap = pooled @ params["fc_w"].T + params["fc_b"]                      # (B, V)
    pair = params["input_vectors"][None, :, :] * params["output_vectors"][:, None, :]
    bav = pair[None] * gap[:, None, None, :]                              # (B, Cout, Cin, V)
    flat = bav.reshape(-1, V)
    logits = (1.0 / math.sqrt(V)) * (flat @ params["kernel_vectors"])
    p = jax.nn.softmax(logits, axis=-1)
    kern = (p @ params["kernel_set"].reshape(K, -1)).reshape(B, Cout, Cin, KH, KW)
    outs = []
    for b in range(B):
        o = jax.lax.conv_general_dilated(
            x[b:b + 1], kern[b],
            window_strides=(stride, stride),
            padding=((padding, padding), (padding, padding)),
            dimension_numbers=("NCHW", "OIHW", "NCHW"))
        outs.append(o[0] + params["bias"][:, None, None])
    return jnp.stack(outs, axis=0)


# --------------------------------------------------------------------------- main
if __name__ == "__main__":
    B, Cin, Cout, H, W = 2, 4, 8, 16, 16
    KH = KW = 3
    num_kernels, vector_length = 16, 16
    stride, padding = 1, 1

    key = jax.random.PRNGKey(0)
    ks = jax.random.split(key, 8)
    params = {
        "kernel_set":     jax.random.uniform(ks[0], (num_kernels, KH, KW), jnp.float32),
        "kernel_vectors": jax.random.normal(ks[1], (vector_length, num_kernels), jnp.float32),
        "input_vectors":  jax.random.normal(ks[2], (Cin, vector_length), jnp.float32),
        "output_vectors": jax.random.normal(ks[3], (Cout, vector_length), jnp.float32),
        "fc_w":           jax.random.normal(ks[4], (vector_length, Cin), jnp.float32)
                          * (1.0 / math.sqrt(Cin)),
        "fc_b":           jax.random.uniform(ks[5], (vector_length,), jnp.float32,
                                             minval=-0.5, maxval=0.5),
        "bias":           jax.random.uniform(ks[6], (Cout,), jnp.float32,
                                             minval=-1.0 / math.sqrt(Cout),
                                             maxval=1.0 / math.sqrt(Cout)),
    }
    x = jax.random.normal(ks[7], (B, Cin, H, W), jnp.float32)

    out = attention_conv2d(params, x, stride=stride, padding=padding)
    out = jax.block_until_ready(out)

    ref = reference_forward(params, x, stride=stride, padding=padding)
    err = float(jnp.max(jnp.abs(out - ref)))
    assert out.shape == (B, Cout, H + 2 * padding - KH + 1, W + 2 * padding - KW + 1), out.shape
    assert err < 5e-2, f"max abs err {err}"

    print("KERNEL_OK")
</pallas_src>

<mosaic_0001>
module attributes {stable_mosaic.version = 11 : i64} {
  func.func @_fused_attention_conv_kernel(%arg0: i32, %arg1: memref<1x1x16xf32, #tpu.memory_space<vmem>>, %arg2: memref<32x16xf32, #tpu.memory_space<vmem>>, %arg3: memref<16x16xf32, #tpu.memory_space<vmem>>, %arg4: memref<16x9xf32, #tpu.memory_space<vmem>>, %arg5: memref<1x4x324xbf16, #tpu.memory_space<vmem>>, %arg6: memref<8x1xf32, #tpu.memory_space<vmem>>, %arg7: memref<1x8x286xf32, #tpu.memory_space<vmem>>) attributes {dimension_semantics = [#tpu.dimension_semantics<parallel>], iteration_bounds = array<i64: 2>, scalar_prefetch = 0 : i64, scratch_operands = 0 : i64, tpu.core_type = #tpu.core_type<tc>, window_params = [{transform_indices = @transform_0, window_bounds = array<i64: 1, 1, 16>}, {pipeline_mode = #tpu.pipeline_mode<synchronous>, transform_indices = @transform_1, window_bounds = array<i64: 32, 16>}, {pipeline_mode = #tpu.pipeline_mode<synchronous>, transform_indices = @transform_2, window_bounds = array<i64: 16, 16>}, {pipeline_mode = #tpu.pipeline_mode<synchronous>, transform_indices = @transform_3, window_bounds = array<i64: 16, 9>}, {transform_indices = @transform_4, window_bounds = array<i64: 1, 4, 324>}, {pipeline_mode = #tpu.pipeline_mode<synchronous>, transform_indices = @transform_5, window_bounds = array<i64: 8, 1>}, {transform_indices = @transform_6, window_bounds = array<i64: 1, 8, 286>}]} {
    %c0 = arith.constant 0 : index
    %c0_0 = arith.constant 0 : index
    %0 = vector.load %arg2[%c0, %c0_0] : memref<32x16xf32, #tpu.memory_space<vmem>>, vector<32x16xf32>
    %c0_1 = arith.constant 0 : index
    %c0_2 = arith.constant 0 : index
    %c0_3 = arith.constant 0 : index
    %1 = vector.load %arg1[%c0_1, %c0_2, %c0_3] : memref<1x1x16xf32, #tpu.memory_space<vmem>>, vector<1x1x16xf32>
    %2 = vector.shape_cast %1 : vector<1x1x16xf32> to vector<1x16xf32>
    %3 = vector.broadcast %2 : vector<1x16xf32> to vector<32x16xf32>
    %4 = arith.mulf %0, %3 : vector<32x16xf32>
    %c0_4 = arith.constant 0 : index
    %c0_5 = arith.constant 0 : index
    %5 = vector.load %arg3[%c0_4, %c0_5] : memref<16x16xf32, #tpu.memory_space<vmem>>, vector<16x16xf32>
    %cst = arith.constant dense<0.000000e+00> : vector<32x16xf32>
    %6 = tpu.matmul %4, %5, %cst {dimension_numbers = #tpu.dot_dimension_numbers<[1], [0], [0], [1], [0, 0, 1, 1], [], []>} : vector<32x16xf32>, vector<16x16xf32>, vector<32x16xf32> -> vector<32x16xf32>
    %cst_6 = arith.constant 2.500000e-01 : f32
    %7 = vector.broadcast %cst_6 : f32 to vector<32x16xf32>
    %8 = arith.mulf %7, %6 : vector<32x16xf32>
    %cst_7 = arith.constant dense<0xFF800000> : vector<32xf32>
    %9 = vector.multi_reduction <maximumf>, %8, %cst_7 [1] : vector<32x16xf32> to vector<32xf32>
    %10 = vector.shape_cast %9 : vector<32xf32> to vector<32x1xf32>
    %11 = vector.broadcast %10 : vector<32x1xf32> to vector<32x16xf32>
    %12 = arith.subf %8, %11 : vector<32x16xf32>
    %13 = math.exp %12 : vector<32x16xf32>
    %cst_8 = arith.constant dense<0.000000e+00> : vector<32xf32>
    %14 = vector.multi_reduction <add>, %13, %cst_8 [1] : vector<32x16xf32> to vector<32xf32>
    %15 = vector.shape_cast %14 : vector<32xf32> to vector<32x1xf32>
    %16 = tpu.reciprocal %15 {approx = true} : vector<32x1xf32> -> vector<32x1xf32>
    %17 = vector.broadcast %16 : vector<32x1xf32> to vector<32x16xf32>
    %18 = arith.mulf %13, %17 : vector<32x16xf32>
    %c0_9 = arith.constant 0 : index
    %c0_10 = arith.constant 0 : index
    %19 = vector.load %arg4[%c0_9, %c0_10] : memref<16x9xf32, #tpu.memory_space<vmem>>, vector<16x9xf32>
    %cst_11 = arith.constant dense<0.000000e+00> : vector<32x9xf32>
    %20 = tpu.matmul %18, %19, %cst_11 {dimension_numbers = #tpu.dot_dimension_numbers<[1], [0], [0], [1], [0, 0, 1, 1], [], []>} : vector<32x16xf32>, vector<16x9xf32>, vector<32x9xf32> -> vector<32x9xf32>
    %21 = vector.shape_cast %20 : vector<32x9xf32> to vector<8x4x9xf32>
    %cst_12 = arith.constant 0.000000e+00 : f32
    %22 = vector.broadcast %cst_12 : f32 to vector<8x286xf32>
    %c0_13 = arith.constant 0 : index
    %c0_14 = arith.constant 0 : index
    %c0_15 = arith.constant 0 : index
    %23 = vector.load %arg5[%c0_13, %c0_14, %c0_15] : memref<1x4x324xbf16, #tpu.memory_space<vmem>>, vector<1x4x286xbf16>
    %24 = vector.shape_cast %23 : vector<1x4x286xbf16> to vector<4x286xbf16>
    %25 = vector.extract_strided_slice %21 {offsets = [0, 0, 0], sizes = [8, 4, 1], strides = [1, 1, 1]} : vector<8x4x9xf32> to vector<8x4x1xf32>
    %26 = vector.shape_cast %25 : vector<8x4x1xf32> to vector<8x4xf32>
    %27 = arith.truncf %26 : vector<8x4xf32> to vector<8x4xbf16>
    %cst_16 = arith.constant dense<0.000000e+00> : vector<8x286xf32>
    %28 = tpu.matmul %27, %24, %cst_16 {dimension_numbers = #tpu.dot_dimension_numbers<[1], [0], [0], [1], [0, 0, 1, 1], [], []>} : vector<8x4xbf16>, vector<4x286xbf16>, vector<8x286xf32> -> vector<8x286xf32>
    %29 = arith.addf %22, %28 : vector<8x286xf32>
    %c0_17 = arith.constant 0 : index
    %c0_18 = arith.constant 0 : index
    %c1 = arith.constant 1 : index
    %30 = vector.load %arg5[%c0_17, %c0_18, %c1] : memref<1x4x324xbf16, #tpu.memory_space<vmem>>, vector<1x4x286xbf16>
    %31 = vector.shape_cast %30 : vector<1x4x286xbf16> to vector<4x286xbf16>
    %32 = vector.extract_strided_slice %21 {offsets = [0, 0, 1], sizes = [8, 4, 1], strides = [1, 1, 1]} : vector<8x4x9xf32> to vector<8x4x1xf32>
    %33 = vector.shape_cast %32 : vector<8x4x1xf32> to vector<8x4xf32>
    %34 = arith.truncf %33 : vector<8x4xf32> to vector<8x4xbf16>
    %cst_19 = arith.constant dense<0.000000e+00> : vector<8x286xf32>
    %35 = tpu.matmul %34, %31, %cst_19 {dimension_numbers = #tpu.dot_dimension_numbers<[1], [0], [0], [1], [0, 0, 1, 1], [], []>} : vector<8x4xbf16>, vector<4x286xbf16>, vector<8x286xf32> -> vector<8x286xf32>
    %36 = arith.addf %29, %35 : vector<8x286xf32>
    %c0_20 = arith.constant 0 : index
    %c0_21 = arith.constant 0 : index
    %c2 = arith.constant 2 : index
    %37 = vector.load %arg5[%c0_20, %c0_21, %c2] : memref<1x4x324xbf16, #tpu.memory_space<vmem>>, vector<1x4x286xbf16>
    %38 = vector.shape_cast %37 : vector<1x4x286xbf16> to vector<4x286xbf16>
    %39 = vector.extract_strided_slice %21 {offsets = [0, 0, 2], sizes = [8, 4, 1], strides = [1, 1, 1]} : vector<8x4x9xf32> to vector<8x4x1xf32>
    %40 = vector.shape_cast %39 : vector<8x4x1xf32> to vector<8x4xf32>
    %41 = arith.truncf %40 : vector<8x4xf32> to vector<8x4xbf16>
    %cst_22 = arith.constant dense<0.000000e+00> : vector<8x286xf32>
    %42 = tpu.matmul %41, %38, %cst_22 {dimension_numbers = #tpu.dot_dimension_numbers<[1], [0], [0], [1], [0, 0, 1, 1], [], []>} : vector<8x4xbf16>, vector<4x286xbf16>, vector<8x286xf32> -> vector<8x286xf32>
    %43 = arith.addf %36, %42 : vector<8x286xf32>
    %c0_23 = arith.constant 0 : index
    %c0_24 = arith.constant 0 : index
    %c18 = arith.constant 18 : index
    %44 = vector.load %arg5[%c0_23, %c0_24, %c18] : memref<1x4x324xbf16, #tpu.memory_space<vmem>>, vector<1x4x286xbf16>
    %45 = vector.shape_cast %44 : vector<1x4x286xbf16> to vector<4x286xbf16>
    %46 = vector.extract_strided_slice %21 {offsets = [0, 0, 3], sizes = [8, 4, 1], strides = [1, 1, 1]} : vector<8x4x9xf32> to vector<8x4x1xf32>
    %47 = vector.shape_cast %46 : vector<8x4x1xf32> to vector<8x4xf32>
    %48 = arith.truncf %47 : vector<8x4xf32> to vector<8x4xbf16>
    %cst_25 = arith.constant dense<0.000000e+00> : vector<8x286xf32>
    %49 = tpu.matmul %48, %45, %cst_25 {dimension_numbers = #tpu.dot_dimension_numbers<[1], [0], [0], [1], [0, 0, 1, 1], [], []>} : vector<8x4xbf16>, vector<4x286xbf16>, vector<8x286xf32> -> vector<8x286xf32>
    %50 = arith.addf %43, %49 : vector<8x286xf32>
    %c0_26 = arith.constant 0 : index
    %c0_27 = arith.constant 0 : index
    %c19 = arith.constant 19 : index
    %51 = vector.load %arg5[%c0_26, %c0_27, %c19] : memref<1x4x324xbf16, #tpu.memory_space<vmem>>, vector<1x4x286xbf16>
    %52 = vector.shape_cast %51 : vector<1x4x286xbf16> to vector<4x286xbf16>
    %53 = vector.extract_strided_slice %21 {offsets = [0, 0, 4], sizes = [8, 4, 1], strides = [1, 1, 1]} : vector<8x4x9xf32> to vector<8x4x1xf32>
    %54 = vector.shape_cast %53 : vector<8x4x1xf32> to vector<8x4xf32>
    %55 = arith.truncf %54 : vector<8x4xf32> to vector<8x4xbf16>
    %cst_28 = arith.constant dense<0.000000e+00> : vector<8x286xf32>
    %56 = tpu.matmul %55, %52, %cst_28 {dimension_numbers = #tpu.dot_dimension_numbers<[1], [0], [0], [1], [0, 0, 1, 1], [], []>} : vector<8x4xbf16>, vector<4x286xbf16>, vector<8x286xf32> -> vector<8x286xf32>
    %57 = arith.addf %50, %56 : vector<8x286xf32>
    %c0_29 = arith.constant 0 : index
    %c0_30 = arith.constant 0 : index
    %c20 = arith.constant 20 : index
    %58 = vector.load %arg5[%c0_29, %c0_30, %c20] : memref<1x4x324xbf16, #tpu.memory_space<vmem>>, vector<1x4x286xbf16>
    %59 = vector.shape_cast %58 : vector<1x4x286xbf16> to vector<4x286xbf16>
    %60 = vector.extract_strided_slice %21 {offsets = [0, 0, 5], sizes = [8, 4, 1], strides = [1, 1, 1]} : vector<8x4x9xf32> to vector<8x4x1xf32>
    %61 = vector.shape_cast %60 : vector<8x4x1xf32> to vector<8x4xf32>
    %62 = arith.truncf %61 : vector<8x4xf32> to vector<8x4xbf16>
    %cst_31 = arith.constant dense<0.000000e+00> : vector<8x286xf32>
    %63 = tpu.matmul %62, %59, %cst_31 {dimension_numbers = #tpu.dot_dimension_numbers<[1], [0], [0], [1], [0, 0, 1, 1], [], []>} : vector<8x4xbf16>, vector<4x286xbf16>, vector<8x286xf32> -> vector<8x286xf32>
    %64 = arith.addf %57, %63 : vector<8x286xf32>
    %c0_32 = arith.constant 0 : index
    %c0_33 = arith.constant 0 : index
    %c36 = arith.constant 36 : index
    %65 = vector.load %arg5[%c0_32, %c0_33, %c36] : memref<1x4x324xbf16, #tpu.memory_space<vmem>>, vector<1x4x286xbf16>
    %66 = vector.shape_cast %65 : vector<1x4x286xbf16> to vector<4x286xbf16>
    %67 = vector.extract_strided_slice %21 {offsets = [0, 0, 6], sizes = [8, 4, 1], strides = [1, 1, 1]} : vector<8x4x9xf32> to vector<8x4x1xf32>
    %68 = vector.shape_cast %67 : vector<8x4x1xf32> to vector<8x4xf32>
    %69 = arith.truncf %68 : vector<8x4xf32> to vector<8x4xbf16>
    %cst_34 = arith.constant dense<0.000000e+00> : vector<8x286xf32>
    %70 = tpu.matmul %69, %66, %cst_34 {dimension_numbers = #tpu.dot_dimension_numbers<[1], [0], [0], [1], [0, 0, 1, 1], [], []>} : vector<8x4xbf16>, vector<4x286xbf16>, vector<8x286xf32> -> vector<8x286xf32>
    %71 = arith.addf %64, %70 : vector<8x286xf32>
    %c0_35 = arith.constant 0 : index
    %c0_36 = arith.constant 0 : index
    %c37 = arith.constant 37 : index
    %72 = vector.load %arg5[%c0_35, %c0_36, %c37] : memref<1x4x324xbf16, #tpu.memory_space<vmem>>, vector<1x4x286xbf16>
    %73 = vector.shape_cast %72 : vector<1x4x286xbf16> to vector<4x286xbf16>
    %74 = vector.extract_strided_slice %21 {offsets = [0, 0, 7], sizes = [8, 4, 1], strides = [1, 1, 1]} : vector<8x4x9xf32> to vector<8x4x1xf32>
    %75 = vector.shape_cast %74 : vector<8x4x1xf32> to vector<8x4xf32>
    %76 = arith.truncf %75 : vector<8x4xf32> to vector<8x4xbf16>
    %cst_37 = arith.constant dense<0.000000e+00> : vector<8x286xf32>
    %77 = tpu.matmul %76, %73, %cst_37 {dimension_numbers = #tpu.dot_dimension_numbers<[1], [0], [0], [1], [0, 0, 1, 1], [], []>} : vector<8x4xbf16>, vector<4x286xbf16>, vector<8x286xf32> -> vector<8x286xf32>
    %78 = arith.addf %71, %77 : vector<8x286xf32>
    %c0_38 = arith.constant 0 : index
    %c0_39 = arith.constant 0 : index
    %c38 = arith.constant 38 : index
    %79 = vector.load %arg5[%c0_38, %c0_39, %c38] : memref<1x4x324xbf16, #tpu.memory_space<vmem>>, vector<1x4x286xbf16>
    %80 = vector.shape_cast %79 : vector<1x4x286xbf16> to vector<4x286xbf16>
    %81 = vector.extract_strided_slice %21 {offsets = [0, 0, 8], sizes = [8, 4, 1], strides = [1, 1, 1]} : vector<8x4x9xf32> to vector<8x4x1xf32>
    %82 = vector.shape_cast %81 : vector<8x4x1xf32> to vector<8x4xf32>
    %83 = arith.truncf %82 : vector<8x4xf32> to vector<8x4xbf16>
    %cst_40 = arith.constant dense<0.000000e+00> : vector<8x286xf32>
    %84 = tpu.matmul %83, %80, %cst_40 {dimension_numbers = #tpu.dot_dimension_numbers<[1], [0], [0], [1], [0, 0, 1, 1], [], []>} : vector<8x4xbf16>, vector<4x286xbf16>, vector<8x286xf32> -> vector<8x286xf32>
    %85 = arith.addf %78, %84 : vector<8x286xf32>
    %c0_41 = arith.constant 0 : index
    %c0_42 = arith.constant 0 : index
    %86 = vector.load %arg6[%c0_41, %c0_42] : memref<8x1xf32, #tpu.memory_space<vmem>>, vector<8x1xf32>
    %87 = vector.broadcast %86 : vector<8x1xf32> to vector<8x286xf32>
    %88 = arith.addf %85, %87 : vector<8x286xf32>
    %c0_43 = arith.constant 0 : index
    %c0_44 = arith.constant 0 : index
    %c0_45 = arith.constant 0 : index
    %89 = vector.load %arg7[%c0_43, %c0_44, %c0_45] : memref<1x8x286xf32, #tpu.memory_space<vmem>>, vector<1x8x286xf32>
    %90 = vector.shape_cast %89 : vector<1x8x286xf32> to vector<8x286xf32>
    %91 = vector.shape_cast %88 : vector<8x286xf32> to vector<1x8x286xf32>
    tpu.vector_store %arg7[%c0_43, %c0_44, %c0_45], %91 {strides = array<i32>} : memref<1x8x286xf32, #tpu.memory_space<vmem>>, vector<1x8x286xf32>,
    return
  }
  func.func @transform_0(%arg0: i32) -> (i32, i32, i32) {
    %c0_i32 = arith.constant 0 : i32
    %c0_i32_0 = arith.constant 0 : i32
    %c0_i32_1 = arith.constant 0 : i32
    return %arg0, %c0_i32, %c0_i32_0 : i32, i32, i32
  }
  func.func @transform_1(%arg0: i32) -> (i32, i32) {
    %c0_i32 = arith.constant 0 : i32
    %c0_i32_0 = arith.constant 0 : i32
    %c0_i32_1 = arith.constant 0 : i32
    return %c0_i32, %c0_i32_0 : i32, i32
  }
  func.func @transform_2(%arg0: i32) -> (i32, i32) {
    %c0_i32 = arith.constant 0 : i32
    %c0_i32_0 = arith.constant 0 : i32
    %c0_i32_1 = arith.constant 0 : i32
    return %c0_i32, %c0_i32_0 : i32, i32
  }
  func.func @transform_3(%arg0: i32) -> (i32, i32) {
    %c0_i32 = arith.constant 0 : i32
    %c0_i32_0 = arith.constant 0 : i32
    %c0_i32_1 = arith.constant 0 : i32
    return %c0_i32, %c0_i32_0 : i32, i32
  }
  func.func @transform_4(%arg0: i32) -> (i32, i32, i32) {
    %c0_i32 = arith.constant 0 : i32
    %c0_i32_0 = arith.constant 0 : i32
    %c0_i32_1 = arith.constant 0 : i32
    return %arg0, %c0_i32, %c0_i32_0 : i32, i32, i32
  }
  func.func @transform_5(%arg0: i32) -> (i32, i32) {
    %c0_i32 = arith.constant 0 : i32
    %c0_i32_0 = arith.constant 0 : i32
    %c0_i32_1 = arith.constant 0 : i32
    return %c0_i32, %c0_i32_0 : i32, i32
  }
  func.func @transform_6(%arg0: i32) -> (i32, i32, i32) {
    %c0_i32 = arith.constant 0 : i32
    %c0_i32_0 = arith.constant 0 : i32
    %c0_i32_1 = arith.constant 0 : i32
    return %arg0, %c0_i32, %c0_i32_0 : i32, i32, i32
  }
}

</mosaic_0001>

<bundles_post_ra>
// kernel: tpu_custom_call.1
= control target key start
LH: loop header
LB: loop body
LE: loop exit
PB: predicated region body
PF: predicated region fallthrough
CT: control target
= control target key end

     0   :  { %11 = vsyncpa [#allocation3], 0  ;;  %s3564_s0 = inlined_call_operand.vmem [shape: f32[2,1,16], index: 0, kind: input, shape index: {}]   ;;  %s3565_s1 = inlined_call_operand.vmem [shape: f32[32,16], index: 1, kind: input, shape index: {}]   ;;  %s3566_s2 = inlined_call_operand.vmem [shape: f32[16,16], index: 2, kind: input, shape index: {}]   ;;  %s3567_s3 = inlined_call_operand.vmem [shape: f32[16,9], index: 3, kind: input, shape index: {}]   ;;  %s3568_s4 = inlined_call_operand.vmem [shape: bf16[2,4,324], index: 4, kind: input, shape index: {}]   ;;  %s3569_s5 = inlined_call_operand.vmem [shape: f32[8,1], index: 5, kind: input, shape index: {}]   ;;  %s3570_s6 = inlined_call_operand.hbm [shape: f32[2,8,286], index: 6, kind: output, shape index: {}]  }
   0x1   :  { %13 = vsyncpa [#allocation3 + $0x1], 0  ;;  %s2742_s21 = smov 0   ;;  %s2744_s22 = smov 0  }
   0x2   :  { %s2746_s23 = smov 0   ;;  %s2748_s24 = smov 0  }
   0x3 LB: > { %s2763_s25 = sadd.s32 4294967295, %s2684_s24   ;;  %s2320_s26 = sadd.s32 4294967294, %s2684_s24   ;;  %s2684_s24 = sphi %s2748_s24, %s3576_s24   ;;  %s2680_s23 = sphi %s2746_s23, %s3575_s23   ;;  %s2676_s22 = sphi %s2744_s22, %s3574_s22   ;;  %s2672_s21 = sphi %s2742_s21, %s3573_s21  }
   0x4   : > { %s2767_s27 = sadd.s32 1, %s2684_s24   ;;  %s162_s28 = sadd.s32 1, %s2680_s23 }
   0x5   : > { %s159_s29 = ssub.s32 %s2684_s24, %s2767_s27  ;;  %p172_p0 = scmp.ne.s32.totalorder %s2680_s23, %s2676_s22 }
   0x6   : > { %p160_p1 = scmp.eq.s32.totalorder %s159_s29, 0  ;;  %p173_p2 = scmp.eq.s32.totalorder %s2763_s25, 1 }
   0x7   : > { %p178_p3 = scmp.ne.s32.totalorder %s2676_s22, %s2672_s21  ;;  %p179_p4 = scmp.eq.s32.totalorder %s2320_s26, 1 }
   0x8   : > { %s2778_s30 = scalar_select %p160_p1, %s2680_s23, %s162_s28  }
   0x9   : > { %p2780_p5 = por %p173_p2, %p172_p0  ;;  %p2784_p6 = por %p179_p4, %p178_p3 }
   0xa   : > { %p2323_p7 = scmp.ge.s32.totalorder %s2684_s24, 1  ;;  %p223_p8 = scmp.lt.s32.totalorder %s2684_s24, 3 }
   0xc   : > { %p224_p9 = pnand %p2323_p7, %p223_p8 }
   0xd   : > { %v280_v0 = vld [vmem:[%s3566_s2] sm:$0xff] (!%p224_p9)  ;;  %v281_v1 = vld [vmem:[%s3566_s2 + $0x8] sm:$0xff] (!%p224_p9)  ;;  %p256_p10 = scmp.lt.s32.totalorder (!%p224_p9), %s2763_s25, 1  ;;  %v267_v5 = vld [vmem:[%s3565_s1 + $0x10] sm:$0xff] (!%p224_p9)  ;;  %vm282_vm0 = vcmask (!%p224_p9), 130048   ;;  %v588_v47 = vlaneseq (!%p224_p9)  ;;  %s2688_s19 = smov (!%p224_p9), 126  }
   0xe   : > { %227 = sbr.rel (%p224_p9) target bundleno = 1361 (0x551), region = 44  ;;  %v2468_v2 = vpack.c.bf16 (!%p224_p9), %v281_v1, %v280_v0  ;;  %v265_v3 = vld [vmem:[%s3565_s1] sm:$0xff] (!%p224_p9)  ;;  %v266_v4 = vld [vmem:[%s3565_s1 + $0x8] sm:$0xff] (!%p224_p9)  ;;  %v268_v10 = vld [vmem:[%s3565_s1 + $0x18] sm:$0xff] (!%p224_p9)  ;;  %v2686_v48 = vmov (!%p224_p9), 1983009808  }
   0xf   : > { %v428_v44 = vld [vmem:[%s3567_s3] sm:$0xff] (!%p224_p9)  ;;  %v429_v45 = vld [vmem:[%s3567_s3 + $0x8] sm:$0xff] (!%p224_p9)  ;;  %v640_v49 = vunpack.c.l.s4 (!%p224_p9), %v2686_v48  ;;  %v589_v50 = vand.u32 (!%p224_p9), 127, %v588_v47  ;;  %v591_v51 = vshrl.u32 (!%p224_p9), %v588_v47, 7  ;;  %s2689_s20 = smov (!%p224_p9), 110   ;;  %s2690_s26 = smov (!%p224_p9), 109  }
  0x10   : > { %2469 = vmatprep.subr.bf16.mxu0 (!%p224_p9), %v2468_v2  ;;  %v2472_v46 = vpack.c.bf16 (!%p224_p9), %v429_v45, %v428_v44  ;;  %vm667_vm1 = vcmask (!%p224_p9), 1041408   ;;  %vm660_vm2 = vcmask (!%p224_p9), 1039360   ;;  %v2697_v45 = vmov (!%p224_p9), 6   ;;  %s2701_s29 = smov (!%p224_p9), 92   ;;  %s2703_s9 = smov (!%p224_p9), 91  }
  0x11   : > { %2471 = vmatpush3.bf16.msra.mxu0 (!%p224_p9), %v2468_v2  ;;  %v641_v52 = vunpack.c.0.s8 (!%p224_p9), %v640_v49  ;;  %v2853_v54 = vsub.s32 (!%p224_p9), %v589_v50, %v591_v51  ;;  %v2698_v48 = vmov (!%p224_p9), 0.0   ;;  %vm2704_vm3 = vmmov (!%p224_p9), 0   ;;  %s2705_s10 = smov (!%p224_p9), 90   ;;  %s253_s14 = sand.u32 (!%p224_p9), 1, %s2676_s22  }
  0x12   : > { %2473 = vmatprep.subr.bf16.mxu1 (!%p224_p9), %v2472_v46  ;;  %vm622_vm4 = vcmask (!%p224_p9), 1041409   ;;  %vm624_vm5 = vcmask (!%p224_p9), 1042434   ;;  %vm626_vm6 = vcmask (!%p224_p9), 1043459   ;;  %vm628_vm7 = vcmask (!%p224_p9), 1044484   ;;  %s2478_s16 = smul.u32 (!%p224_p9), 384, %s2763_s25 }
  0x13   : > { %2475 = vmatpush3.bf16.msra.mxu1 (!%p224_p9), %v2472_v46  ;;  %v2855_v55 = vsub.s32 (!%p224_p9), %v641_v52, %v591_v51  ;;  %vm630_vm8 = vcmask (!%p224_p9), 1045509   ;;  %vm632_vm9 = vcmask (!%p224_p9), 1046534   ;;  %vm634_vm10 = vcmask (!%p224_p9), 1047559  }
  0x14   : > { %2414 = vmatprep.subr.bf16.mxu1 (!%p224_p9), %v2698_v48  ;;  %vm663_vm11 = vcmask (!%p224_p9), 31744   ;;  %vm1003_vm12 = vcmask (!%p224_p9), 1031168   ;;  %vm1190_vm13 = vcmask (!%p224_p9), 900096   ;;  %vm1377_vm14 = vcmask (!%p224_p9), 891904  }
  0x15   : > { %s2798_s13 = scalar_select %p256_p10, %s2763_s25, 1  ;;  %vm1564_vm15 = vcmask 883712  }
  0x16   : > { %s3520_s25 = scalar_lea.hbm %s3570_s6, %s2478_s16 }
  0x17   : > { %s258_s28 = scalar_lea.vmem %s3564_s0, %s2798_s13  ;;  %s2477_s15 = smul.u32 6, %s2798_s13 }
  0x18   : > { %v2325_v6 = vld [vmem:[%s258_s28] ss:$0 sm:$0xff]  ;;  %s2687_s13 = smov 127   ;;  %s2699_s28 = smov 108  }
  0x19   : > { %v276_v7 = vmul.f32 %v2325_v6, %v265_v3  ;;  %v277_v8 = vmul.f32 %v2325_v6, %v266_v4  ;;  %v278_v9 = vmul.f32 %v2325_v6, %v267_v5  ;;  %v279_v11 = vmul.f32 %v2325_v6, %v268_v10  ;;  %s2850_s18 = scalar_lea.vmem %s3568_s4, %s2477_s15  ;;  %s2476_s15 = smul.u32 24, %s253_s14 }
  0x1a   : > { %v539_v53 = vld [vmem:[%s2850_s18] sm:$0x3f] }
  0x1b   : > { %2398 = vmatprep.mubr.msk.f32.mxu0 %vm282_vm0, %v276_v7  ;;  %v638_v56 = vcombine.high %v539_v53, %v539_v53  ;;  %v915_v57 = vld [vmem:[%s2850_s18] sm:$0x3f]  ;;  %v2859_v58 = vrot.slane %v539_v53, %v2855_v55  ;;  %s255_s17 = scalar_lea.vmem [#allocation2], %s2476_s15 }
  0x1c   : > { %2399 = vmatmul.mubr.msk.f32.vlgmr.msra.gmra.mrb[0].mxu0 %vm282_vm0, %v277_v8  ;;  %v988_v61 = vrot.slane %v915_v57, %v2855_v55  ;;  %v1102_v62 = vld [vmem:[%s2850_s18] sm:$0x3f]  ;;  %v981_v63 = vcombine.high %v915_v57, %v915_v57 }
  0x1d   : > { %2401 = vmatprep.mubr.msk.f32.mxu0 %vm282_vm0, %v278_v9  ;;  %v2863_v59 = vrot.slane %v638_v56, %v2855_v55  ;;  %v2867_v60 = vcombine.high %v2859_v58, %v2859_v58  ;;  %v1175_v1 = vrot.slane %v1102_v62, %v2855_v55  ;;  %v1289_v2 = vld [vmem:[%s2850_s18] sm:$0x3f]  ;;  %v1168_v6 = vcombine.high %v1102_v62, %v1102_v62 }
  0x1e   : > { %v996_v0 = vcombine.high %v988_v61, %v988_v61  ;;  %v995_v3 = vrot.slane %v981_v63, %v2855_v55  ;;  %v1362_v5 = vrot.slane %v1289_v2, %v2855_v55 }
  0x1f   : > { %v1183_v4 = vcombine.high %v1175_v1, %v1175_v1  ;;  %v1182_v8 = vrot.slane %v1168_v6, %v2855_v55 }
  0x20   : > { %2402 = vmatmul.mubr.msk.f32.gmra.mrb[2].mxu0 %vm282_vm0, %v279_v11  ;;  %v1370_v7 = vcombine.high %v1362_v5, %v1362_v5 }
  0xef   : > { %v2400_v12 = vpop.f32.mrb[0].mxu0 }
  0xf0   : > { %v361_v13 = vpop.f32.mrb[1].mxu0  ;;  %v381_v15 = vmul.f32 0.25, %v2400_v12 }
  0xf1   : > { %v380_v14 = vmul.f32 0.25, %v361_v13 }
  0xf2   : > { %v387_v21 = vsel %vm282_vm0, %v381_v15, -inf }
  0xf3   : > { %v2403_v16 = vpop.f32.mrb[2].mxu0  ;;  %v384_v17 = vsel %vm282_vm0, %v380_v14, -inf }
  0xf4   : > { %385 = vmax.xlane.f32.xlu0 %v384_v17  ;;  %v371_v18 = vpop.f32.mrb[3].mxu0  ;;  %v383_v19 = vmul.f32 0.25, %v2403_v16 }
  0xf5   : > { %v382_v20 = vmul.f32 0.25, %v371_v18 }
  0xf6   : > { %v393_v23 = vsel %vm282_vm0, %v383_v19, -inf }
  0xf7   : > { %v390_v22 = vsel %vm282_vm0, %v382_v20, -inf }
  0xf8   : > { %388 = vmax.xlane.f32.xlu0 %v387_v21  ;;  %391 = vmax.xlane.f32.xlu1 %v390_v22  ;;  %v1355_v21 = vcombine.high %v1289_v2, %v1289_v2  ;;  %v2995_v2 = vld [vmem:[%s2850_s18] sm:$0x3f] }
  0xfa   : > { %v1369_v22 = vrot.slane %v1355_v21, %v2855_v55 }
  0xfc   : > { %394 = vmax.xlane.f32.xlu1 %v393_v23  ;;  %v2691_v23 = vmov 1  }
  0xfd   : > { %2538 = vset.pattern.permute.xlu1 %v2691_v23  ;;  %2545 = vset.pattern.permute.xlu0 %v2691_v23 }
 0x181   : > { %v386_v24 = vpop.xlane.xlu0 %385 }
 0x182   : > { %v396_v25 = vsub.f32 %v380_v14, %v386_v24  ;;  %v2692_v24 = vmov 0  }
 0x183   : > { %709 = vmatprep.mubr.bf16.mxu0 %v2692_v24 }
 0x184   : > { %v400_v26 = vmul.f32 1.442695, %v396_v25 }
 0x185   : > { %v389_v27 = vpop.xlane.xlu0 %388  ;;  %v392_v28 = vpop.xlane.xlu1 %391 }
 0x186   : > { %2606 = vpow2.f32 %v400_v26  ;;  %v397_v29 = vsub.f32 %v381_v15, %v389_v27  ;;  %v398_v30 = vsub.f32 %v382_v20, %v392_v28 }
 0x188   : > { %v402_v31 = vmul.f32 1.442695, %v397_v29  ;;  %v404_v32 = vmul.f32 1.442695, %v398_v30 }
 0x189   : > { %v395_v33 = vpop.xlane.xlu1 %394 }
 0x18a   : > { %2608 = vpow2.f32 %v402_v31  ;;  %v399_v34 = vsub.f32 %v383_v19, %v395_v33 }
 0x18b   : > { %2610 = vpow2.f32 %v404_v32 }
 0x18c   : > { %v406_v35 = vmul.f32 1.442695, %v399_v34 }
 0x18e   : > { %2612 = vpow2.f32 %v406_v35 }
 0x190   : > { %v2824_v36 = vpop.eup %2606 }
 0x191   : > { %v408_v37 = vsel %vm282_vm0, %v2824_v36, 0.0 }
 0x192   : > { %409 = vadd.xlane.f32.xlu0 %v408_v37 }
 0x194   : > { %v2828_v38 = vpop.eup %2608 }
 0x195   : > { %v2830_v39 = vpop.eup %2610  ;;  %v411_v40 = vsel %vm282_vm0, %v2828_v38, 0.0 }
 0x196   : > { %412 = vadd.xlane.f32.xlu1 %v411_v40  ;;  %v414_v41 = vsel %vm282_vm0, %v2830_v39, 0.0  ;;  %v2694_v40 = vmov 2  }
 0x197   : > { %415 = vadd.xlane.f32.xlu0 %v414_v41  ;;  %v2695_v41 = vmov 5  }
 0x198   : > { %v2836_v42 = vpop.eup %2612 }
 0x199   : > { %v417_v43 = vsel %vm282_vm0, %v2836_v42, 0.0 }
 0x19a   : > { %418 = vadd.xlane.f32.xlu1 %v417_v43  ;;  %v2696_v43 = vmov 3  }
 0x1ab   : > { %656 = vrot.lane.b32.xlu1 %v2867_v60, %s2687_s13 }
 0x1ad   : > { %654 = vrot.lane.b32.xlu0 %v2859_v58, %s2687_s13 }
 0x1af   : > { %997 = vrot.lane.b32.xlu1 %v988_v61, %s2688_s19  ;;  %v2969_v61 = vld [vmem:[%s2850_s18] sm:$0x3f] }
 0x1b0   : > { %v2977_v63 = vrot.slane %v2969_v61, %v2855_v55 }
 0x1b1   : > { %658 = vrot.lane.b32.xlu0 %v2863_v59, %s2687_s13 }
 0x1b3   : > { %1001 = vrot.lane.b32.xlu1 %v995_v3, %s2688_s19  ;;  %v2700_v3 = vmov 7  }
 0x1b5   : > { %999 = vrot.lane.b32.xlu0 %v996_v0, %s2688_s19 }
 0x1b7   : > { %1184 = vrot.lane.b32.xlu1 %v1175_v1, %s2689_s20  ;;  %v1557_v1 = vcombine.high %v2977_v63, %v2977_v63 }
 0x1b9   : > { %1186 = vrot.lane.b32.xlu0 %v1183_v4, %s2689_s20  ;;  %v3001_v4 = vrot.slane %v2995_v2, %v2855_v55 }
 0x1bb   : > { %1188 = vrot.lane.b32.xlu1 %v1182_v8, %s2689_s20  ;;  %s2238_s20 = scalar_lea.sflag [#allocation3], %s253_s14 }
 0x1bd   : > { %1373 = vrot.lane.b32.xlu0 %v1370_v7, %s2690_s26  ;;  %v3017_v7 = vld [vmem:[%s2850_s18] sm:$0x3f] }
 0x1bf   : > { %1371 = vrot.lane.b32.xlu1 %v1362_v5, %s2690_s26  ;;  %v1744_v5 = vcombine.high %v3001_v4, %v3001_v4 }
 0x1c3   : > { %1375 = vrot.lane.b32.xlu1 %v1369_v22, %s2690_s26 }
 0x21f   : > { %v410_v9 = vpop.xlane.xlu0 %409 }
 0x220   : > { %2614 = vrcp.f32 %v410_v9  ;;  %v2702_v9 = vmov 8  }
 0x223   : > { %v413_v10 = vpop.xlane.xlu1 %412 }
 0x224   : > { %v416_v11 = vpop.xlane.xlu0 %415  ;;  %2616 = vrcp.f32 %v413_v10  ;;  %v3027_v10 = vrot.slane %v3017_v7, %v2855_v55 }
 0x225   : > { %2618 = vrcp.f32 %v416_v11 }
 0x226   : > { %v1931_v11 = vcombine.high %v3027_v10, %v3027_v10 }
 0x227   : > { %v419_v12 = vpop.xlane.xlu1 %418 }
 0x228   : > { %2620 = vrcp.f32 %v419_v12  ;;  %v655_v25 = vpop.permute.xlu0 %654 }
 0x22a   : > { %v2615_v13 = vpop.eup %2614 }
 0x22b   : > { %v424_v14 = vmul.f32 %v2615_v13, %v2824_v36  ;;  %v657_v27 = vpop.permute.xlu1 %656 }
 0x22c   : > { %v659_v26 = vpop.permute.xlu0 %658  ;;  %v661_v28 = vsel %vm660_vm2, %v655_v25, %v657_v27 }
 0x22d   : > { %2408 = vmatprep.mubr.msk.f32.mxu1 %vm282_vm0, %v424_v14  ;;  %v662_v29 = vsel %vm660_vm2, %v657_v27, %v659_v26  ;;  %v669_v30 = vsel %vm667_vm1, %v661_v28, 0  ;;  %v675_v47 = vsel %vm667_vm1, %v659_v26, 0  ;;  %vm1938_vm2 = vcmask 744448  }
 0x22e   : > { %v2617_v15 = vpop.eup %2616  ;;  %2334 = vmatprep.subr.msk.bf16.mxu0 %vm667_vm1, %v662_v29 }
 0x22f   : > { %v2619_v16 = vpop.eup %2618  ;;  %v425_v17 = vmul.f32 %v2617_v15, %v2828_v38  ;;  %678 = vmatpush1.bf16.msra.mxu0 %v669_v30  ;;  %v3011_v6 = vpop.permute.xlu1 %997 }
 0x230   : > { %v426_v18 = vmul.f32 %v2619_v16, %v2830_v39  ;;  %2337 = vmatprep.subr.msk.bf16.mxu0 %vm667_vm1, %v2867_v60  ;;  %v2693_v39 = vmov 4   ;;  %v3044_v14 = vpop.permute.xlu0 %999 }
 0x231   : > { %2409 = vmatmul.mubr.msk.f32.vlgmr.msra.gmra.mrb[0].mxu1 %vm282_vm0, %v425_v17 }
 0x232   : > { %v2621_v19 = vpop.eup %2620  ;;  %2411 = vmatprep.mubr.msk.f32.mxu1 %vm282_vm0, %v426_v18  ;;  %2415 = vmatpush3.bf16.msra.mxu1 %v675_v47 }
 0x233   : > { %v427_v20 = vmul.f32 %v2621_v19, %v2836_v42  ;;  %2420 = vmatprep.subr.bf16.mxu1 %v2698_v48  ;;  %v3019_v8 = vpop.permute.xlu1 %1001 }
 0x234   : > { %v3053_v17 = vpop.permute.xlu0 %1186 }
 0x235   : > { %2412 = vmatmul.mubr.msk.f32.gmra.mrb[2].mxu1 %vm282_vm0, %v427_v20  ;;  %vm1751_vm0 = vcmask 752640  }
 0x236   : > { %2416 = vmatprep.mubr.msk.bf16.mxu1 %vm2704_vm3, %v2698_v48 }
 0x237   : > { %v3033_v12 = vpop.permute.xlu1 %1184 }
 0x238   : > { %v3059_v20 = vpop.permute.xlu0 %1373 }
 0x23b   : > { %v3039_v13 = vpop.permute.xlu1 %1188 }
 0x23f   : > { %v3047_v15 = vpop.permute.xlu1 %1371 }
 0x243   : > { %v3057_v19 = vpop.permute.xlu1 %1375 }
 0x304   : > { %v2410_v31 = vpop.f32.mrb[0].mxu1 }
 0x305   : > { %v542_v32 = vpack.c.bf16 %v2410_v31, %v2410_v31  ;;  %v508_v33 = vpop.f32.mrb[1].mxu1  ;;  %v532_v42 = vcombine.high %v2410_v31, %v2410_v31 }
 0x306   : > { %v540_v34 = vpack.c.bf16 %v508_v33, %v508_v33  ;;  %v531_v49 = vcombine.high %v508_v33, %v508_v33 }
 0x307   : > { %v2894_v35 = vunpack.c.l.b16 %v542_v32  ;;  %v543_v44 = vpack.c.bf16 %v532_v42, %v532_v42 }
 0x308   : > { %v2896_v36 = vunpack.c.l.b16 %v540_v34  ;;  %v2898_v37 = vpop.f32.mrb[2].mxu1  ;;  %v541_v50 = vpack.c.bf16 %v531_v49, %v531_v49  ;;  %v1542_v34 = vcombine.high %v2969_v61, %v2969_v61 }
 0x309   : > { %571 = vperm.xlu1 %2538, %v2894_v35   ;;  %v2901_v38 = vpop.f32.mrb[3].mxu1  ;;  %v2916_v46 = vunpack.c.l.b16 %v543_v44  ;;  %v546_v52 = vpack.c.bf16 %v2898_v37, %v2898_v37  ;;  %v534_v60 = vcombine.high %v2898_v37, %v2898_v37 }
 0x30a   : > { %565 = vperm.xlu0 %2545, %v2896_v36   ;;  %v2933_v51 = vunpack.c.l.b16 %v541_v50  ;;  %v544_v56 = vpack.c.bf16 %v2901_v38, %v2901_v38  ;;  %v533_v16 = vcombine.high %v2901_v38, %v2901_v38  ;;  %v1556_v38 = vrot.slane %v1542_v34, %v2855_v55 }
 0x30b   : > { %v2945_v53 = vunpack.c.l.b16 %v546_v52  ;;  %v547_v62 = vpack.c.bf16 %v534_v60, %v534_v60 }
 0x30c   : > { %v2960_v57 = vunpack.c.l.b16 %v544_v56  ;;  %v545_v18 = vpack.c.bf16 %v533_v16, %v533_v16 }
 0x30d   : > { %2539 = vset.pattern.permute.xlu1 %v2692_v24  ;;  %v2979_v0 = vunpack.c.l.b16 %v547_v62 }
 0x30e   : > { %765 = vperm.xlu1 %2539, %v2894_v35   ;;  %2548 = vset.pattern.permute.xlu0 %v2693_v39  ;;  %v561_v21 = vunpack.c.l.b16 %v545_v18 }
 0x30f   : > { %1291 = vperm.xlu0 %2548, %v2896_v36  }
 0x312   : > { %2540 = vset.pattern.permute.xlu1 %v2694_v40 }
 0x313   : > { %923 = vperm.xlu1 %2540, %v2894_v35   ;;  %2549 = vset.pattern.permute.xlu0 %v2695_v41 }
 0x314   : > { %1478 = vperm.xlu0 %2549, %v2896_v36  }
 0x317   : > { %2541 = vset.pattern.permute.xlu1 %v2696_v43 }
 0x318   : > { %1110 = vperm.xlu1 %2541, %v2894_v35   ;;  %2550 = vset.pattern.permute.xlu0 %v2697_v45 }
 0x319   : > { %1665 = vperm.xlu0 %2550, %v2896_v36  }
 0x31c   : > { %2542 = vset.pattern.permute.xlu1 %v2693_v39 }
 0x31d   : > { %1297 = vperm.xlu1 %2542, %v2894_v35   ;;  %2554 = vset.pattern.permute.xlu0 %v2693_v39 }
 0x31e   : > { %1300 = vperm.xlu0 %2554, %v2916_v46  }
 0x321   : > { %2543 = vset.pattern.permute.xlu1 %v2695_v41 }
 0x322   : > { %1484 = vperm.xlu1 %2543, %v2894_v35   ;;  %2555 = vset.pattern.permute.xlu0 %v2695_v41 }
 0x323   : > { %1487 = vperm.xlu0 %2555, %v2916_v46  }
 0x326   : > { %2544 = vset.pattern.permute.xlu1 %v2697_v45 }
 0x327   : > { %1671 = vperm.xlu1 %2544, %v2894_v35   ;;  %2556 = vset.pattern.permute.xlu0 %v2697_v45 }
 0x328   : > { %1674 = vperm.xlu0 %2556, %v2916_v46  }
 0x32b   : > { %2546 = vset.pattern.permute.xlu1 %v2692_v24 }
 0x32c   : > { %759 = vperm.xlu1 %2546, %v2896_v36   ;;  %2558 = vset.pattern.permute.xlu0 %v2692_v24 }
 0x32d   : > { %762 = vperm.xlu0 %2558, %v2933_v51  }
 0x330   : > { %2547 = vset.pattern.permute.xlu1 %v2694_v40 }
 0x331   : > { %917 = vperm.xlu1 %2547, %v2896_v36   ;;  %2559 = vset.pattern.permute.xlu0 %v2694_v40 }
 0x332   : > { %920 = vperm.xlu0 %2559, %v2933_v51  }
 0x335   : > { %2551 = vset.pattern.permute.xlu1 %v2691_v23 }
 0x336   : > { %574 = vperm.xlu1 %2551, %v2916_v46   ;;  %935 = vperm.xlu0 %2559, %v2945_v53  }
 0x33a   : > { %2552 = vset.pattern.permute.xlu1 %v2692_v24  ;;  %2566 = vset.pattern.permute.xlu0 %v2693_v39 }
 0x33b   : > { %768 = vperm.xlu1 %2552, %v2916_v46   ;;  %1309 = vperm.xlu0 %2566, %v2945_v53  }
 0x33f   : > { %2553 = vset.pattern.permute.xlu1 %v2694_v40  ;;  %2567 = vset.pattern.permute.xlu0 %v2695_v41 }
 0x340   : > { %926 = vperm.xlu1 %2553, %v2916_v46   ;;  %1496 = vperm.xlu0 %2567, %v2945_v53  }
 0x344   : > { %2557 = vset.pattern.permute.xlu1 %v2691_v23  ;;  %2569 = vset.pattern.permute.xlu0 %v2692_v24 }
 0x345   : > { %568 = vperm.xlu1 %2557, %v2933_v51   ;;  %771 = vperm.xlu0 %2569, %v2960_v57  }
 0x349   : > { %2560 = vset.pattern.permute.xlu1 %v2696_v43  ;;  %2570 = vset.pattern.permute.xlu0 %v2694_v40 }
 0x34a   : > { %1107 = vperm.xlu1 %2560, %v2933_v51   ;;  %929 = vperm.xlu0 %2570, %v2960_v57  }
 0x34e   : > { %2561 = vset.pattern.permute.xlu1 %v2693_v39  ;;  %2576 = vset.pattern.permute.xlu0 %v2692_v24 }
 0x34f   : > { %1294 = vperm.xlu1 %2561, %v2933_v51   ;;  %780 = vperm.xlu0 %2576, %v2979_v0  }
 0x353   : > { %2562 = vset.pattern.permute.xlu1 %v2695_v41  ;;  %1560 = vrot.lane.b32.xlu0 %v1557_v1, %s2699_s28 }
 0x354   : > { %1481 = vperm.xlu1 %2562, %v2933_v51   ;;  %2583 = vset.pattern.permute.xlu0 %v2697_v45 }
 0x357   : > { %1683 = vperm.xlu0 %2583, %v2945_v53  }
 0x358   : > { %2563 = vset.pattern.permute.xlu1 %v2697_v45 }
 0x359   : > { %1668 = vperm.xlu1 %2563, %v2933_v51  }
 0x35b   : > { %2586 = vset.pattern.permute.xlu0 %v2700_v3 }
 0x35c   : > { %1852 = vperm.xlu0 %2586, %v2896_v36  }
 0x35d   : > { %2564 = vset.pattern.permute.xlu1 %v2691_v23 }
 0x35e   : > { %583 = vperm.xlu1 %2564, %v2945_v53  }
 0x360   : > { %1861 = vperm.xlu0 %2586, %v2916_v46  }
 0x362   : > { %2565 = vset.pattern.permute.xlu1 %v2692_v24 }
 0x363   : > { %777 = vperm.xlu1 %2565, %v2945_v53  }
 0x364   : > { %1747 = vrot.lane.b32.xlu0 %v1744_v5, %s2701_s29 }
 0x367   : > { %2568 = vset.pattern.permute.xlu1 %v2691_v23 }
 0x368   : > { %1870 = vperm.xlu0 %2586, %v2945_v53   ;;  %577 = vperm.xlu1 %2568, %v2960_v57  }
 0x36c   : > { %2588 = vset.pattern.permute.xlu0 %v2702_v9  ;;  %2571 = vset.pattern.permute.xlu1 %v2696_v43 }
 0x36d   : > { %2039 = vperm.xlu0 %2588, %v2896_v36   ;;  %1116 = vperm.xlu1 %2571, %v2960_v57  }
 0x371   : > { %2048 = vperm.xlu0 %2588, %v2916_v46   ;;  %2572 = vset.pattern.permute.xlu1 %v2693_v39 }
 0x372   : > { %1303 = vperm.xlu1 %2572, %v2960_v57  }
 0x375   : > { %1934 = vrot.lane.b32.xlu0 %v1931_v11, %s2703_s9 }
 0x376   : > { %2573 = vset.pattern.permute.xlu1 %v2695_v41 }
 0x377   : > { %1490 = vperm.xlu1 %2573, %v2960_v57  }
 0x379   : > { %2057 = vperm.xlu0 %2588, %v2945_v53  }
 0x37b   : > { %2574 = vset.pattern.permute.xlu1 %v2697_v45 }
 0x37c   : > { %1677 = vperm.xlu1 %2574, %v2960_v57  }
 0x37d   : > { %2590 = vset.pattern.permute.xlu0 %v2696_v43 }
 0x37e   : > { %1104 = vperm.xlu0 %2590, %v2896_v36   ;;  %v2037_v36 = vld [vmem:[%s2850_s18] sm:$0x3f]  ;;  %s2252_s18 = sshll.u32 %s255_s17, 4  ;;  %s3522_s18 = int_to_ptr.vmem [resolvable:$true] %s2252_s18 }
 0x37f   : > { %s2622_s26 = scalar_lea.vmem %s3522_s18, 384 }
 0x380   : > { %2575 = vset.pattern.permute.xlu1 %v2691_v23  ;;  %p2623_p11 = scmp.ne.s32.totalorder %s3522_s18, %s2622_s26 }
 0x381   : > { %586 = vperm.xlu1 %2575, %v2979_v0  }
 0x382   : > { %1113 = vperm.xlu0 %2590, %v2916_v46   ;;  %p2624_p12 = pnand %p2623_p11, %p2780_p5 }
 0x384   : > { %p2625_p13 = pneg %p2624_p12 }
 0x385   : > { %2577 = vset.pattern.permute.xlu1 %v2694_v40 }
 0x386   : > { %1122 = vperm.xlu0 %2590, %v2945_v53   ;;  %938 = vperm.xlu1 %2577, %v2979_v0  }
 0x388   : > { %v3064_v22 = vpop.permute.xlu1 %571 }
 0x389   : > { %v3066_v25 = vpop.permute.xlu0 %565 }
 0x38a   : > { %2578 = vset.pattern.permute.xlu1 %v2696_v43  ;;  %1119 = vperm.xlu0 %2590, %v561_v21  }
 0x38b   : > { %1125 = vperm.xlu1 %2578, %v2979_v0  }
 0x38d   : > { %v766_v26 = vpop.permute.xlu1 %765 }
 0x38e   : > { %v3070_v27 = vpop.permute.xlu0 %1291  ;;  %2591 = vset.pattern.permute.xlu0 %v2693_v39 }
 0x38f   : > { %2579 = vset.pattern.permute.xlu1 %v2693_v39  ;;  %1306 = vperm.xlu0 %2591, %v561_v21   ;;  %v3108_v39 = vrot.slane %v2037_v36, %v2855_v55 }
 0x390   : > { %1312 = vperm.xlu1 %2579, %v2979_v0  }
 0x392   : > { %v3075_v28 = vpop.permute.xlu1 %923 }
 0x393   : > { %v3077_v29 = vpop.permute.xlu0 %1478  ;;  %2592 = vset.pattern.permute.xlu0 %v2695_v41 }
 0x394   : > { %2580 = vset.pattern.permute.xlu1 %v2695_v41  ;;  %1493 = vperm.xlu0 %2592, %v561_v21   ;;  %v2103_v41 = vcombine.high %v2037_v36, %v2037_v36 }
 0x395   : > { %1499 = vperm.xlu1 %2580, %v2979_v0  }
 0x396   : > { %v2117_v44 = vrot.slane %v2103_v41, %v2855_v55 }
 0x397   : > { %v3082_v30 = vpop.permute.xlu1 %1110 }
 0x398   : > { %v3084_v31 = vpop.permute.xlu0 %1665  ;;  %2593 = vset.pattern.permute.xlu0 %v2697_v45 }
 0x399   : > { %2581 = vset.pattern.permute.xlu1 %v2691_v23  ;;  %1680 = vperm.xlu0 %2593, %v561_v21  }
 0x39a   : > { %580 = vperm.xlu1 %2581, %v561_v21  }
 0x39c   : > { %v3088_v32 = vpop.permute.xlu1 %1297 }
 0x39d   : > { %v3090_v33 = vpop.permute.xlu0 %1300  ;;  %2594 = vset.pattern.permute.xlu0 %v2700_v3 }
 0x39e   : > { %1867 = vperm.xlu0 %2594, %v561_v21   ;;  %1558 = vrot.lane.b32.xlu1 %v2977_v63, %s2699_s28  ;;  %v951_v63 = vrot.slane %v3075_v28, %v2853_v54 }
 0x39f   : > { %2582 = vset.pattern.permute.xlu1 %v2692_v24 }
 0x3a1   : > { %v3101_v23 = vpop.permute.xlu1 %1484 }
 0x3a2   : > { %v3103_v37 = vpop.permute.xlu0 %1487  ;;  %2595 = vset.pattern.permute.xlu0 %v2702_v9  ;;  %774 = vperm.xlu1 %2582, %v561_v21  }
 0x3a3   : > { %2054 = vperm.xlu0 %2595, %v561_v21  }
 0x3a6   : > { %1562 = vrot.lane.b32.xlu1 %v1556_v38, %s2699_s28  ;;  %v3111_v42 = vpop.permute.xlu1 %1671  ;;  %s2706_s28 = smov [#allocation2]  }
 0x3a7   : > { %v3113_v43 = vpop.permute.xlu0 %1674  ;;  %2584 = vset.pattern.permute.xlu1 %v2694_v40  ;;  %2119 = vrot.lane.b32.xlu0 %v3108_v39, %s2705_s10  ;;  %v793_v40 = vrot.slane %v766_v26, %v2853_v54 }
 0x3a8   : > { %2597 = vset.pattern.permute.xlu0 %v2692_v24 }
 0x3aa   : > { %932 = vperm.xlu1 %2584, %v561_v21  }
 0x3ab   : > { %v760_v46 = vpop.permute.xlu1 %759  ;;  %2123 = vrot.lane.b32.xlu0 %v2117_v44, %s2705_s10 }
 0x3ac   : > { %v785_v47 = vrot.slane %v760_v46, %v2853_v54  ;;  %v763_v49 = vpop.permute.xlu0 %762  ;;  %v593_v46 = vrot.slane %v3066_v25, %v2853_v54 }
 0x3ad   : > { %v789_v50 = vrot.slane %v763_v49, %v2853_v54  ;;  %v601_v49 = vrot.slane %v3064_v22, %v2853_v54 }
 0x3ae   : > { %2585 = vset.pattern.permute.xlu1 %v2697_v45 }
 0x3af   : > { %v814_v52 = vsel %vm622_vm4, %v789_v50, %v785_v47  ;;  %1686 = vperm.xlu1 %2585, %v2979_v0  }
 0x3b0   : > { %v918_v53 = vpop.permute.xlu1 %917  ;;  %v815_v56 = vsel %vm624_vm5, %v793_v40, %v814_v52 }
 0x3b1   : > { %v943_v60 = vrot.slane %v918_v53, %v2853_v54  ;;  %v921_v61 = vpop.permute.xlu0 %920 }
 0x3b2   : > { %v947_v62 = vrot.slane %v921_v61, %v2853_v54 }
 0x3b3   : > { %2587 = vset.pattern.permute.xlu1 %v2700_v3  ;;  %v1729_v3 = vcombine.high %v2995_v2, %v2995_v2 }
 0x3b4   : > { %v972_v1 = vsel %vm622_vm4, %v947_v62, %v943_v60  ;;  %1855 = vperm.xlu1 %2587, %v2933_v51   ;;  %v1317_v60 = vrot.slane %v3070_v27, %v2853_v54  ;;  %v1325_v62 = vrot.slane %v3088_v32, %v2853_v54  ;;  %v1504_v27 = vrot.slane %v3077_v29, %v2853_v54 }
 0x3b5   : > { %v3135_v45 = vpop.permute.xlu0 %935  ;;  %v575_v5 = vpop.permute.xlu1 %574  ;;  %v973_v11 = vsel %vm624_vm5, %v951_v63, %v972_v1  ;;  %v1743_v38 = vrot.slane %v1729_v3, %v2855_v55  ;;  %v1329_v63 = vrot.slane %v3090_v33, %v2853_v54  ;;  %v1916_v33 = vcombine.high %v3017_v7, %v3017_v7 }
 0x3b6   : > { %v1691_v7 = vrot.slane %v3084_v31, %v2853_v54 }
 0x3b8   : > { %1858 = vperm.xlu1 %2587, %v2894_v35  }
 0x3ba   : > { %v3139_v16 = vpop.permute.xlu0 %1309  ;;  %v769_v18 = vpop.permute.xlu1 %768 }
 0x3bb   : > { %v797_v21 = vrot.slane %v769_v18, %v2853_v54  ;;  %v1512_v18 = vrot.slane %v3101_v23, %v2853_v54  ;;  %v1699_v23 = vrot.slane %v3111_v42, %v2853_v54 }
 0x3bc   : > { %1864 = vperm.xlu1 %2587, %v2960_v57  }
 0x3bd   : > { %v3146_v26 = vsel %vm626_vm6, %v797_v21, %v815_v56 }
 0x3bf   : > { %v3148_v28 = vpop.permute.xlu0 %1496  ;;  %v927_v34 = vpop.permute.xlu1 %926 }
 0x3c0   : > { %v955_v36 = vrot.slane %v927_v34, %v2853_v54  ;;  %1745 = vrot.lane.b32.xlu1 %v3001_v4, %s2701_s29  ;;  %v605_v4 = vrot.slane %v575_v5, %v2853_v54 }
 0x3c2   : > { %v3155_v41 = vsel %vm626_vm6, %v955_v36, %v973_v11 }
 0x3c4   : > { %v3157_v44 = vpop.permute.xlu0 %771  ;;  %1749 = vrot.lane.b32.xlu1 %v1743_v38, %s2701_s29  ;;  %v569_v2 = vpop.permute.xlu1 %568  ;;  %s2626_s29 = sshll.u32 %s2706_s28, 4  ;;  %s2627_s29 = int_to_ptr.vmem [resolvable:$false] %s2626_s29 }
 0x3c5   : > { %v597_v47 = vrot.slane %v569_v2, %v2853_v54  ;;  %p2629_p0 = scmp.lt.s32.totalorder %s3522_s18, %s2627_s29 }
 0x3c7   : > { %v623_v50 = vsel %vm622_vm4, %v597_v47, %v593_v46 }
 0x3c8   : > { %v625_v40 = vsel %vm624_vm5, %v601_v49, %v623_v50  ;;  %1873 = vperm.xlu1 %2587, %v2979_v0  }
 0x3c9   : > { %v3169_v52 = vpop.permute.xlu0 %929  ;;  %v3171_v53 = vpop.permute.xlu1 %1107  ;;  %v3174_v56 = vsel %vm626_vm6, %v605_v4, %v625_v40  ;;  %v2224_v40 = vld [vmem:[%s3569_s5] sm:$0xff] }
 0x3cc   : > { %2589 = vset.pattern.permute.xlu1 %v2702_v9 }
 0x3cd   : > { %2042 = vperm.xlu1 %2589, %v2933_v51  }
 0x3ce   : > { %v3178_v22 = vpop.permute.xlu0 %780  ;;  %v1295_v25 = vpop.permute.xlu1 %1294 }
 0x3cf   : > { %v1321_v61 = vrot.slane %v1295_v25, %v2853_v54 }
 0x3d1   : > { %v1346_v1 = vsel %vm622_vm4, %v1321_v61, %v1317_v60  ;;  %2045 = vperm.xlu1 %2589, %v2894_v35   ;;  %v1516_v35 = vrot.slane %v3103_v37, %v2853_v54  ;;  %v1703_v37 = vrot.slane %v3113_v43, %v2853_v54 }
 0x3d2   : > { %v1347_v51 = vsel %vm624_vm5, %v1325_v62, %v1346_v1  ;;  %v3190_v9 = vpop.permute.xlu0 %1560 }
 0x3d3   : > { %v1482_v5 = vpop.permute.xlu1 %1481  ;;  %v3193_v11 = vsel %vm626_vm6, %v1329_v63, %v1347_v51 }
 0x3d4   : > { %v1508_v32 = vrot.slane %v1482_v5, %v2853_v54 }
 0x3d5   : > { %2051 = vperm.xlu1 %2589, %v2960_v57   ;;  %v1930_v57 = vrot.slane %v1916_v33, %v2855_v55  ;;  %v2118_v55 = vcombine.high %v3108_v39, %v3108_v39  ;;  %v1134_v33 = vrot.slane %v3171_v53, %v2853_v54 }
 0x3d6   : > { %v1533_v21 = vsel %vm622_vm4, %v1508_v32, %v1504_v27  ;;  %v3206_v3 = vpop.permute.xlu0 %1683 }
 0x3d7   : > { %v1534_v34 = vsel %vm624_vm5, %v1512_v18, %v1533_v21  ;;  %v1138_v21 = vrot.slane %v3082_v30, %v2853_v54 }
 0x3d8   : > { %v1669_v29 = vpop.permute.xlu1 %1668  ;;  %v1535_v36 = vsel %vm626_vm6, %v1516_v35, %v1534_v34 }
 0x3d9   : > { %v1695_v38 = vrot.slane %v1669_v29, %v2853_v54  ;;  %1932 = vrot.lane.b32.xlu1 %v3027_v10, %s2703_s9 }
 0x3db   : > { %v1720_v2 = vsel %vm622_vm4, %v1695_v38, %v1691_v7  ;;  %v3221_v46 = vpop.permute.xlu0 %1852 }
 0x3dc   : > { %v1721_v47 = vsel %vm624_vm5, %v1699_v23, %v1720_v2 }
 0x3dd   : > { %1936 = vrot.lane.b32.xlu1 %v1930_v57, %s2703_s9  ;;  %v3225_v31 = vpop.permute.xlu1 %583  ;;  %v1722_v10 = vsel %vm626_vm6, %v1703_v37, %v1721_v47  ;;  %s2628_s9 = scalar_lea.vmem %s2627_s29, 768 }
 0x3de   : > { %p2630_p1 = scmp.lt.s32.totalorder %s2628_s9, %s2622_s26 }
 0x3df   : > { %v3228_v49 = vpop.permute.xlu0 %1861 }
 0x3e0   : > { %p2631_p2 = por %p2630_p1, %p2629_p0 }
 0x3e1   : > { %2060 = vperm.xlu1 %2589, %v2979_v0  }
 0x3e2   : > { %v3233_v42 = vpop.permute.xlu1 %777  ;;  %p2632_p3 = pnand %p2631_p2, %p2625_p13 }
 0x3e3   : > { %v3235_v43 = vpop.permute.xlu0 %1747 }
 0x3e5   : > { %2121 = vrot.lane.b32.xlu1 %v2118_v55, %s2705_s10 }
 0x3e6   : > { %2596 = vset.pattern.permute.xlu1 %v2692_v24 }
 0x3e7   : > { %v3239_v4 = vpop.permute.xlu0 %1870  ;;  %v578_v50 = vpop.permute.xlu1 %577 }
 0x3e9   : > { %2227 = vperm.xlu1 %2596, %v2224_v40  }
 0x3ec   : > { %v3244_v0 = vpop.permute.xlu0 %2039  ;;  %v3246_v25 = vpop.permute.xlu1 %1116 }
 0x3f0   : > { %v3248_v39 = vpop.permute.xlu0 %2048 }
 0x3f1   : > { %v1304_v60 = vpop.permute.xlu1 %1303 }
 0x3f2   : > { %v1333_v37 = vrot.slane %v1304_v60, %v2853_v54 }
 0x3f4   : > { %v3250_v61 = vpop.permute.xlu0 %1934  ;;  %v1349_v55 = vsel %vm628_vm7, %v1333_v37, %v3193_v11 }
 0x3f6   : > { %v1491_v62 = vpop.permute.xlu1 %1490 }
 0x3f7   : > { %v1520_v63 = vrot.slane %v1491_v62, %v2853_v54 }
 0x3f8   : > { %v3253_v1 = vpop.permute.xlu0 %2057 }
 0x3f9   : > { %v1536_v51 = vsel %vm628_vm7, %v1520_v63, %v1535_v36 }
 0x3fb   : > { %v1678_v5 = vpop.permute.xlu1 %1677 }
 0x3fc   : > { %v1707_v27 = vrot.slane %v1678_v5, %v2853_v54 }
 0x3fd   : > { %v1105_v32 = vpop.permute.xlu0 %1104 }
 0x3fe   : > { %v1723_v18 = vsel %vm628_vm7, %v1707_v27, %v1722_v10  ;;  %v1130_v35 = vrot.slane %v1105_v32, %v2853_v54  ;;  %v1341_v10 = vrot.slane %v3139_v16, %v2853_v54  ;;  %v1528_v27 = vrot.slane %v3148_v28, %v2853_v54 }
 0x3ff   : > { %v609_v32 = vrot.slane %v578_v50, %v2853_v54 }
 0x400   : > { %v1159_v34 = vsel %vm622_vm4, %v1134_v33, %v1130_v35  ;;  %v587_v29 = vpop.permute.xlu1 %586 }
 0x401   : > { %v3264_v7 = vpop.permute.xlu0 %1113  ;;  %v3267_v36 = vsel %vm624_vm5, %v1138_v21, %v1159_v34  ;;  %v1715_v34 = vrot.slane %v3206_v3, %v2853_v54  ;;  %v629_v28 = vsel %vm628_vm7, %v609_v32, %v3174_v56  ;;  %v801_v56 = vrot.slane %v3157_v44, %v2853_v54 }
 0x402   : > { %v1005_v44 = vsel %vm1003_vm12, %v3044_v14, %v3019_v8 }
 0x405   : > { %v3269_v38 = vpop.permute.xlu0 %1122  ;;  %v3271_v57 = vpop.permute.xlu1 %938 }
 0x409   : > { %v3273_v53 = vpop.permute.xlu0 %1119 }
 0x40a   : > { %v3275_v23 = vpop.permute.xlu1 %1125 }
 0x40e   : > { %v1307_v2 = vpop.permute.xlu0 %1306 }
 0x40f   : > { %v1337_v30 = vrot.slane %v1307_v2, %v2853_v54  ;;  %v3279_v47 = vpop.permute.xlu1 %1312  ;;  %v617_v2 = vrot.slane %v3225_v31, %v2853_v54 }
 0x411   : > { %v1350_v40 = vsel %vm630_vm8, %v1337_v30, %v1349_v55 }
 0x412   : > { %v3287_v62 = vsel %vm632_vm9, %v1341_v10, %v1350_v40 }
 0x413   : > { %v1494_v63 = vpop.permute.xlu0 %1493 }
 0x414   : > { %v1524_v60 = vrot.slane %v1494_v63, %v2853_v54  ;;  %v3290_v5 = vpop.permute.xlu1 %1499 }
 0x416   : > { %v1537_v16 = vsel %vm630_vm8, %v1524_v60, %v1536_v51  ;;  %v621_v51 = vrot.slane %v587_v29, %v2853_v54  ;;  %v832_v29 = vsel %vm667_vm1, %v2863_v59, 0  ;;  %v809_v59 = vrot.slane %v3233_v42, %v2853_v54 }
 0x417   : > { %v3297_v11 = vsel %vm632_vm9, %v1528_v27, %v1537_v16  ;;  %v813_v27 = vrot.slane %v3178_v22, %v2853_v54  ;;  %v1004_v42 = vsel %vm1003_vm12, %v3011_v6, %v3044_v14  ;;  %v1192_v14 = vsel %vm1190_vm13, %v3053_v17, %v3039_v13 }
 0x418   : > { %v1681_v33 = vpop.permute.xlu0 %1680 }
 0x419   : > { %v1711_v35 = vrot.slane %v1681_v33, %v2853_v54  ;;  %v581_v21 = vpop.permute.xlu1 %580  ;;  %v1142_v33 = vrot.slane %v3264_v7, %v2853_v54 }
 0x41a   : > { %v613_v37 = vrot.slane %v581_v21, %v2853_v54 }
 0x41b   : > { %v1724_v50 = vsel %vm630_vm8, %v1711_v35, %v1723_v18  ;;  %v826_v18 = vsel %vm667_vm1, %v2859_v58, 0  ;;  %v817_v58 = vsel %vm628_vm7, %v801_v56, %v3146_v26  ;;  %v959_v35 = vrot.slane %v3169_v52, %v2853_v54 }
 0x41c   : > { %v631_v30 = vsel %vm630_vm8, %v613_v37, %v629_v28  ;;  %v3311_v10 = vsel %vm632_vm9, %v1715_v34, %v1724_v50  ;;  %v1010_v34 = vsel %vm667_vm1, %v1004_v42, 0  ;;  %v1016_v37 = vsel %vm667_vm1, %v3019_v8, 0 }
 0x41d   : > { %v633_v3 = vsel %vm632_vm9, %v617_v2, %v631_v30  ;;  %v3314_v55 = vpop.permute.xlu1 %1558  ;;  %v1161_v7 = vsel %vm626_vm6, %v1142_v33, %v3267_v36  ;;  %v1150_v52 = vrot.slane %v3273_v53, %v2853_v54  ;;  %v967_v28 = vrot.slane %v3135_v45, %v2853_v54 }
 0x41e   : > { %v635_v40 = vsel %vm634_vm10, %v621_v51, %v633_v3  ;;  %v975_v8 = vsel %vm628_vm7, %v959_v35, %v3155_v41  ;;  %v1146_v50 = vrot.slane %v3246_v25, %v2853_v54  ;;  %v971_v36 = vrot.slane %v3271_v57, %v2853_v54 }
 0x41f   : > { %v636_v31 = vpack.c.b16 %v635_v40, %v635_v40  ;;  %v1191_v25 = vsel %vm1190_vm13, %v3033_v12, %v3053_v17  ;;  %v1154_v3 = vrot.slane %v3269_v38, %v2853_v54  ;;  %v1158_v56 = vrot.slane %v3275_v23, %v2853_v54 }
 0x420   : > { %v1162_v45 = vsel %vm628_vm7, %v1146_v50, %v1161_v7  ;;  %v1203_v12 = vsel %vm667_vm1, %v3039_v13, 0  ;;  %v1379_v17 = vsel %vm1377_vm14, %v3059_v20, %v3057_v19  ;;  %v1378_v13 = vsel %vm1377_vm14, %v3047_v15, %v3059_v20 }
 0x421   : > { %2335 = vmatmul.mubr.msk.bf16.vlgmr.msra.gmra.mrb[4].mxu0 %vm663_vm11, %v636_v31  ;;  %2417 = vmatmul.mubr.msk.bf16.vlgmr.msra.gmra.mrb[4].mxu1 %vm663_vm11, %v636_v31  ;;  %v775_v63 = vpop.permute.xlu1 %774  ;;  %v1163_v51 = vsel %vm630_vm8, %v1150_v52, %v1162_v45  ;;  %v1197_v31 = vsel %vm667_vm1, %v1191_v25, 0  ;;  %v1390_v20 = vsel %vm667_vm1, %v3057_v19, 0  ;;  %v1902_v35 = vrot.slane %v3239_v4, %v2853_v54 }
 0x422   : > { %835 = vmatpush1.bf16.msra.mxu0 %v826_v18  ;;  %v805_v60 = vrot.slane %v775_v63, %v2853_v54  ;;  %2421 = vmatpush3.bf16.msra.mxu1 %v832_v29  ;;  %v1164_v18 = vsel %vm632_vm9, %v1154_v3, %v1163_v51  ;;  %v1878_v63 = vrot.slane %v3221_v46, %v2853_v54  ;;  %v1868_v46 = vpop.permute.xlu0 %1867 }
 0x423   : > { %2340 = vmatprep.subr.msk.bf16.mxu0 %vm667_vm1, %v1005_v44  ;;  %866 = vmatprep.mubr.bf16.mxu0 %v2692_v24  ;;  %v1165_v23 = vsel %vm634_vm10, %v1158_v56, %v1164_v18 }
 0x424   : > { %v818_v16 = vsel %vm630_vm8, %v805_v60, %v817_v58  ;;  %2422 = vmatprep.mubr.msk.bf16.mxu1 %vm2704_vm3, %v2698_v48  ;;  %2426 = vmatprep.subr.bf16.mxu1 %v2698_v48  ;;  %v1166_v60 = vpack.c.b16 %v1165_v23, %v1165_v23  ;;  %v1384_v58 = vsel %vm667_vm1, %v1378_v13, 0 }
 0x425   : > { %v819_v32 = vsel %vm632_vm9, %v809_v59, %v818_v16  ;;  %v3342_v26 = vpop.permute.xlu1 %1562  ;;  %v1345_v59 = vrot.slane %v3279_v47, %v2853_v54  ;;  %v1890_v16 = vrot.slane %v3228_v49, %v2853_v54 }
 0x426   : > { %v820_v22 = vsel %vm634_vm10, %v813_v27, %v819_v32  ;;  %v1566_v47 = vsel %vm1564_vm15, %v3190_v9, %v3342_v26  ;;  %v1577_v4 = vsel %vm667_vm1, %v3342_v26, 0 }
 0x427   : > { %v821_v21 = vpack.c.b16 %v820_v22, %v820_v22  ;;  %v1352_v33 = vsel %vm634_vm10, %v1345_v59, %v3287_v62  ;;  %v1898_v22 = vrot.slane %v1868_v46, %v2853_v54 }
 0x429   : > { %2338 = vmatmul.mubr.msk.bf16.vlgmr.msra.gmra.mrb[8].mxu0 %vm663_vm11, %v821_v21  ;;  %2423 = vmatmul.mubr.msk.bf16.vlgmr.msra.gmra.mrb[8].mxu1 %vm663_vm11, %v821_v21  ;;  %v933_v6 = vpop.permute.xlu1 %932  ;;  %v1565_v21 = vsel %vm1564_vm15, %v3314_v55, %v3190_v9 }
 0x42a   : > { %1019 = vmatpush1.bf16.msra.mxu0 %v1010_v34  ;;  %2427 = vmatpush3.bf16.msra.mxu1 %v1016_v37  ;;  %v963_v2 = vrot.slane %v933_v6, %v2853_v54  ;;  %v1353_v37 = vpack.c.b16 %v1352_v33, %v1352_v33  ;;  %v1571_v52 = vsel %vm667_vm1, %v1565_v21, 0 }
 0x42b   : > { %2343 = vmatprep.subr.msk.bf16.mxu0 %vm667_vm1, %v1192_v14  ;;  %1050 = vmatprep.mubr.bf16.mxu0 %v2692_v24  ;;  %v1532_v14 = vrot.slane %v3290_v5, %v2853_v54 }
 0x42c   : > { %v976_v53 = vsel %vm630_vm8, %v963_v2, %v975_v8  ;;  %2428 = vmatprep.mubr.msk.bf16.mxu1 %vm2704_vm3, %v2698_v48  ;;  %2432 = vmatprep.subr.bf16.mxu1 %v2698_v48 }
 0x42d   : > { %v977_v41 = vsel %vm632_vm9, %v967_v28, %v976_v53  ;;  %v1539_v5 = vsel %vm634_vm10, %v1532_v14, %v3297_v11 }
 0x42e   : > { %v978_v30 = vsel %vm634_vm10, %v971_v36, %v977_v41  ;;  %v3386_v57 = vpop.permute.xlu1 %1686  ;;  %v1540_v2 = vpack.c.b16 %v1539_v5, %v1539_v5  ;;  %v2065_v41 = vrot.slane %v3244_v0, %v2853_v54 }
 0x42f   : > { %v979_v40 = vpack.c.b16 %v978_v30, %v978_v30  ;;  %v1719_v8 = vrot.slane %v3386_v57, %v2853_v54  ;;  %v2077_v30 = vrot.slane %v3248_v39, %v2853_v54  ;;  %v2089_v39 = vrot.slane %v3253_v1, %v2853_v54 }
 0x431   : > { %2341 = vmatmul.mubr.msk.bf16.vlgmr.msra.gmra.mrb[12].mxu0 %vm663_vm11, %v979_v40  ;;  %2429 = vmatmul.mubr.msk.bf16.vlgmr.msra.gmra.mrb[12].mxu1 %vm663_vm11, %v979_v40 }
 0x432   : > { %1206 = vmatpush1.bf16.msra.mxu0 %v1197_v31  ;;  %2433 = vmatpush3.bf16.msra.mxu1 %v1203_v12 }
 0x433   : > { %2346 = vmatprep.subr.msk.bf16.mxu0 %vm667_vm1, %v1379_v17  ;;  %v1856_v38 = vpop.permute.xlu1 %1855  ;;  %1237 = vmatprep.mubr.bf16.mxu0 %v2692_v24 }
 0x434   : > { %2434 = vmatprep.mubr.msk.bf16.mxu1 %vm2704_vm3, %v2698_v48  ;;  %2438 = vmatprep.subr.bf16.mxu1 %v2698_v48  ;;  %v1882_v29 = vrot.slane %v1856_v38, %v2853_v54 }
 0x436   : > { %v1907_v15 = vsel %vm622_vm4, %v1882_v29, %v1878_v63 }
 0x437   : > { %v1859_v44 = vpop.permute.xlu1 %1858 }
 0x438   : > { %v1886_v27 = vrot.slane %v1859_v44, %v2853_v54 }
 0x439   : > { %2344 = vmatmul.mubr.msk.bf16.vlgmr.msra.gmra.mrb[16].mxu0 %vm663_vm11, %v1166_v60  ;;  %2435 = vmatmul.mubr.msk.bf16.vlgmr.msra.gmra.mrb[16].mxu1 %vm663_vm11, %v1166_v60 }
 0x43a   : > { %v1908_v32 = vsel %vm624_vm5, %v1886_v27, %v1907_v15  ;;  %1393 = vmatpush1.bf16.msra.mxu0 %v1384_v58  ;;  %2439 = vmatpush3.bf16.msra.mxu1 %v1390_v20 }
 0x43b   : > { %2349 = vmatprep.subr.msk.bf16.mxu0 %vm667_vm1, %v1566_v47  ;;  %v1909_v49 = vsel %vm626_vm6, %v1890_v16, %v1908_v32  ;;  %v1865_v42 = vpop.permute.xlu1 %1864  ;;  %1424 = vmatprep.mubr.bf16.mxu0 %v2692_v24 }
 0x43c   : > { %v1894_v19 = vrot.slane %v1865_v42, %v2853_v54  ;;  %2440 = vmatprep.mubr.msk.bf16.mxu1 %vm2704_vm3, %v2698_v48  ;;  %2444 = vmatprep.subr.bf16.mxu1 %v2698_v48 }
 0x43e   : > { %v1910_v34 = vsel %vm628_vm7, %v1894_v19, %v1909_v49 }
 0x43f   : > { %v1911_v62 = vsel %vm630_vm8, %v1898_v22, %v1910_v34  ;;  %v1746_v6 = vpop.permute.xlu1 %1745 }
 0x440   : > { %v1912_v7 = vsel %vm632_vm9, %v1902_v35, %v1911_v62  ;;  %v1752_v26 = vsel %vm1751_vm0, %v1746_v6, %v3235_v43 }
 0x441   : > { %2347 = vmatmul.mubr.msk.bf16.vlgmr.msra.gmra.mrb[20].mxu0 %vm663_vm11, %v1353_v37  ;;  %2441 = vmatmul.mubr.msk.bf16.vlgmr.msra.gmra.mrb[20].mxu1 %vm663_vm11, %v1353_v37  ;;  %v1758_v50 = vsel %vm667_vm1, %v1752_v26, 0 }
 0x442   : > { %1580 = vmatpush1.bf16.msra.mxu0 %v1571_v52  ;;  %2445 = vmatpush3.bf16.msra.mxu1 %v1577_v4 }
 0x443   : > { %v1750_v9 = vpop.permute.xlu1 %1749  ;;  %1611 = vmatprep.mubr.bf16.mxu0 %v2692_v24  ;;  %2446 = vmatprep.mubr.msk.bf16.mxu1 %vm2704_vm3, %v2698_v48 }
 0x444   : > { %v1753_v55 = vsel %vm1751_vm0, %v3235_v43, %v1750_v9  ;;  %2450 = vmatprep.subr.bf16.mxu1 %v2698_v48  ;;  %v1764_v36 = vsel %vm667_vm1, %v1750_v9, 0  ;;  %v1726_v43 = vsel %vm634_vm10, %v1719_v8, %v3311_v10  ;;  %v2055_v10 = vpop.permute.xlu0 %2054 }
 0x445   : > { %2352 = vmatprep.subr.msk.bf16.mxu0 %vm667_vm1, %v1753_v55  ;;  %v1727_v45 = vpack.c.b16 %v1726_v43, %v1726_v43  ;;  %v2085_v31 = vrot.slane %v2055_v10, %v2853_v54 }
 0x447   : > { %v1874_v28 = vpop.permute.xlu1 %1873 }
 0x448   : > { %v2120_v18 = vpop.permute.xlu0 %2119  ;;  %v1906_v17 = vrot.slane %v1874_v28, %v2853_v54 }
 0x449   : > { %2350 = vmatmul.mubr.msk.bf16.vlgmr.msra.gmra.mrb[24].mxu0 %vm663_vm11, %v1540_v2  ;;  %2447 = vmatmul.mubr.msk.bf16.vlgmr.msra.gmra.mrb[24].mxu1 %vm663_vm11, %v1540_v2 }
 0x44a   : > { %1767 = vmatpush1.bf16.msra.mxu0 %v1758_v50  ;;  %2451 = vmatpush3.bf16.msra.mxu1 %v1764_v36  ;;  %v1913_v63 = vsel %vm634_vm10, %v1906_v17, %v1912_v7 }
 0x44b   : > { %1798 = vmatprep.mubr.bf16.mxu0 %v2692_v24  ;;  %2452 = vmatprep.mubr.msk.bf16.mxu1 %vm2704_vm3, %v2698_v48  ;;  %v1914_v27 = vpack.c.b16 %v1913_v63, %v1913_v63 }
 0x44c   : > { %v2043_v11 = vpop.permute.xlu1 %2042  ;;  %2456 = vmatprep.subr.bf16.mxu1 %v2698_v48  ;;  %v2124_v44 = vpop.permute.xlu0 %2123 }
 0x44d   : > { %v2069_v53 = vrot.slane %v2043_v11, %v2853_v54  ;;  %v2138_v16 = vsel %vm667_vm1, %v2124_v44, 0 }
 0x44f   : > { %v2094_v57 = vsel %vm622_vm4, %v2069_v53, %v2065_v41  ;;  %vm2125_vm4 = vcmask 736256  }
 0x450   : > { %v2046_v25 = vpop.permute.xlu1 %2045 }
 0x451   : > { %v2073_v51 = vrot.slane %v2046_v25, %v2853_v54  ;;  %2353 = vmatmul.mubr.msk.bf16.vlgmr.msra.gmra.mrb[28].mxu0 %vm663_vm11, %v1727_v45  ;;  %2453 = vmatmul.mubr.msk.bf16.vlgmr.msra.gmra.mrb[28].mxu1 %vm663_vm11, %v1727_v45 }
 0x452   : > { %2458 = vmatprep.mubr.msk.bf16.mxu1 %vm2704_vm3, %v2698_v48  ;;  %1985 = vmatprep.mubr.bf16.mxu0 %v2692_v24 }
 0x453   : > { %v2095_v0 = vsel %vm624_vm5, %v2073_v51, %v2094_v57 }
 0x454   : > { %v2096_v3 = vsel %vm626_vm6, %v2077_v30, %v2095_v0  ;;  %v2052_v40 = vpop.permute.xlu1 %2051 }
 0x455   : > { %v2081_v56 = vrot.slane %v2052_v40, %v2853_v54 }
 0x457   : > { %v2097_v12 = vsel %vm628_vm7, %v2081_v56, %v2096_v3 }
 0x458   : > { %v2098_v38 = vsel %vm630_vm8, %v2085_v31, %v2097_v12  ;;  %v1933_v23 = vpop.permute.xlu1 %1932 }
 0x459   : > { %v2099_v13 = vsel %vm632_vm9, %v2089_v39, %v2098_v38  ;;  %v1939_v29 = vsel %vm1938_vm2, %v1933_v23, %v3250_v61 }
 0x45a   : > { %v1945_v59 = vsel %vm667_vm1, %v1939_v29, 0 }
 0x45c   : > { %v1937_v60 = vpop.permute.xlu1 %1936 }
 0x45d   : > { %v1940_v58 = vsel %vm1938_vm2, %v3250_v61, %v1937_v60  ;;  %v1951_v1 = vsel %vm667_vm1, %v1937_v60, 0 }
 0x45e   : > { %2355 = vmatprep.subr.msk.bf16.mxu0 %vm667_vm1, %v1940_v58  ;;  %2457 = vmatpush3.bf16.msra.mxu1 %v1951_v1 }
 0x45f   : > { %1954 = vmatpush1.bf16.msra.mxu0 %v1945_v59  ;;  %2462 = vmatprep.subr.bf16.mxu1 %v2698_v48 }
 0x460   : > { %v2061_v15 = vpop.permute.xlu1 %2060 }
 0x461   : > { %v2093_v20 = vrot.slane %v2061_v15, %v2853_v54  ;;  %2459 = vmatmul.mubr.msk.bf16.vlgmr.msra.gmra.mrb[32].mxu1 %vm663_vm11, %v1914_v27 }
 0x462   : > { %2356 = vmatmul.mubr.msk.bf16.vlgmr.msra.gmra.mrb[32].mxu0 %vm663_vm11, %v1914_v27  ;;  %2463 = vmatpush3.bf16.msra.mxu1 %v2138_v16 }
 0x463   : > { %2464 = vmatprep.mubr.msk.bf16.mxu1 %vm2704_vm3, %v2698_v48  ;;  %2172 = vmatprep.mubr.bf16.mxu0 %v2692_v24  ;;  %v2100_v61 = vsel %vm634_vm10, %v2093_v20, %v2099_v13 }
 0x464   : > { %v2122_v46 = vpop.permute.xlu1 %2121  ;;  %v2101_v54 = vpack.c.b16 %v2100_v61, %v2100_v61 }
 0x465   : > { %v2126_v47 = vsel %vm2125_vm4, %v2120_v18, %v2122_v46  ;;  %v2127_v32 = vsel %vm2125_vm4, %v2122_v46, %v2124_v44 }
 0x466   : > { %v2132_v49 = vsel %vm667_vm1, %v2126_v47, 0  ;;  %2358 = vmatprep.subr.msk.bf16.mxu0 %vm667_vm1, %v2127_v32  ;;  %vm2235_vm1 = vcmask 244736  }
 0x467   : > { %2141 = vmatpush1.bf16.msra.mxu0 %v2132_v49 }
 0x469   : > { %2465 = vmatmul.mubr.msk.bf16.vlgmr.msra.gmra.mrb[36].mxu1 %vm663_vm11, %v2101_v54 }
 0x46a   : > { %2359 = vmatmul.mubr.msk.bf16.vlgmr.msra.gmra.mrb[36].mxu0 %vm663_vm11, %v2101_v54 }
 0x4f4   : > { %v711_v42 = vpop.f32.mrb[4].mxu0  ;;  %v752_v33 = vpop.f32.mrb[4].mxu1 }
 0x4f5   : > { %v713_v48 = vpop.f32.mrb[5].mxu0  ;;  %v2418_v19 = vpop.f32.mrb[5].mxu1 }
 0x4f6   : > { %v715_v24 = vpop.f32.mrb[6].mxu0  ;;  %v755_v22 = vpop.f32.mrb[6].mxu1 }
 0x4f7   : > { %v716_v35 = vpop.f32.mrb[7].mxu0  ;;  %v2419_v21 = vpop.f32.mrb[7].mxu1 }
 0x4fc   : > { %v868_v34 = vpop.f32.mrb[8].mxu0  ;;  %v909_v37 = vpop.f32.mrb[8].mxu1 }
 0x4fd   : > { %v869_v62 = vadd.f32 %v868_v34, %v711_v42  ;;  %v910_v6 = vadd.f32 %v909_v37, %v752_v33  ;;  %v870_v14 = vpop.f32.mrb[9].mxu0  ;;  %v2424_v7 = vpop.f32.mrb[9].mxu1 }
 0x4fe   : > { %v871_v52 = vadd.f32 %v870_v14, %v713_v48  ;;  %v872_v4 = vpop.f32.mrb[10].mxu0  ;;  %v912_v9 = vpop.f32.mrb[10].mxu1 }
 0x4ff   : > { %v873_v5 = vpop.f32.mrb[11].mxu0  ;;  %v2425_v55 = vpop.f32.mrb[11].mxu1 }
 0x504   : > { %v1052_v26 = vpop.f32.mrb[12].mxu0  ;;  %v1093_v2 = vpop.f32.mrb[12].mxu1 }
 0x505   : > { %v1099_v28 = vadd.f32 %v1052_v26, %v869_v62  ;;  %v1101_v8 = vadd.f32 %v1093_v2, %v910_v6  ;;  %v1054_v50 = vpop.f32.mrb[13].mxu0  ;;  %v2430_v36 = vpop.f32.mrb[13].mxu1 }
 0x506   : > { %v1100_v43 = vadd.f32 %v1054_v50, %v871_v52  ;;  %v1056_v11 = vpop.f32.mrb[14].mxu0  ;;  %v1096_v53 = vpop.f32.mrb[14].mxu1 }
 0x507   : > { %v1057_v45 = vpop.f32.mrb[15].mxu0  ;;  %v2431_v41 = vpop.f32.mrb[15].mxu1 }
 0x50c   : > { %v1239_v25 = vpop.f32.mrb[16].mxu0  ;;  %v1280_v51 = vpop.f32.mrb[16].mxu1 }
 0x50d   : > { %v1286_v30 = vadd.f32 %v1239_v25, %v1099_v28  ;;  %v1288_v10 = vadd.f32 %v1280_v51, %v1101_v8  ;;  %v1241_v57 = vpop.f32.mrb[17].mxu0  ;;  %v2436_v0 = vpop.f32.mrb[17].mxu1 }
 0x50e   : > { %v1287_v3 = vadd.f32 %v1241_v57, %v1100_v43  ;;  %v1243_v40 = vpop.f32.mrb[18].mxu0  ;;  %v1283_v56 = vpop.f32.mrb[18].mxu1 }
 0x50f   : > { %v1244_v31 = vpop.f32.mrb[19].mxu0  ;;  %v2437_v18 = vpop.f32.mrb[19].mxu1 }
 0x510   : > { %v2228_v8 = vpop.permute.xlu1 %2227 }
 0x514   : > { %v1426_v39 = vpop.f32.mrb[20].mxu0  ;;  %v1467_v12 = vpop.f32.mrb[20].mxu1 }
 0x515   : > { %v1473_v17 = vadd.f32 %v1426_v39, %v1286_v30  ;;  %v1475_v38 = vadd.f32 %v1467_v12, %v1288_v10  ;;  %v1428_v23 = vpop.f32.mrb[21].mxu0  ;;  %v2442_v13 = vpop.f32.mrb[21].mxu1 }
 0x516   : > { %v1474_v29 = vadd.f32 %v1428_v23, %v1287_v3  ;;  %v1430_v63 = vpop.f32.mrb[22].mxu0  ;;  %v1470_v60 = vpop.f32.mrb[22].mxu1 }
 0x517   : > { %v1431_v44 = vpop.f32.mrb[23].mxu0  ;;  %v2443_v58 = vpop.f32.mrb[23].mxu1 }
 0x51c   : > { %v1613_v1 = vpop.f32.mrb[24].mxu0  ;;  %v1654_v59 = vpop.f32.mrb[24].mxu1 }
 0x51d   : > { %v1660_v27 = vadd.f32 %v1613_v1, %v1473_v17  ;;  %v1662_v16 = vadd.f32 %v1654_v59, %v1475_v38  ;;  %v1615_v15 = vpop.f32.mrb[25].mxu0  ;;  %v2448_v20 = vpop.f32.mrb[25].mxu1 }
 0x51e   : > { %v1661_v61 = vadd.f32 %v1615_v15, %v1474_v29  ;;  %v1617_v46 = vpop.f32.mrb[26].mxu0  ;;  %v1657_v47 = vpop.f32.mrb[26].mxu1 }
 0x51f   : > { %v1618_v32 = vpop.f32.mrb[27].mxu0  ;;  %v2449_v49 = vpop.f32.mrb[27].mxu1 }
 0x524   : > { %v1800_v54 = vpop.f32.mrb[28].mxu0  ;;  %v1841_v42 = vpop.f32.mrb[28].mxu1 }
 0x525   : > { %v1847_v33 = vadd.f32 %v1800_v54, %v1660_v27  ;;  %v1849_v48 = vadd.f32 %v1841_v42, %v1662_v16  ;;  %v1802_v19 = vpop.f32.mrb[29].mxu0  ;;  %v2454_v24 = vpop.f32.mrb[29].mxu1 }
 0x526   : > { %v1848_v22 = vadd.f32 %v1802_v19, %v1661_v61  ;;  %v1804_v35 = vpop.f32.mrb[30].mxu0  ;;  %v1844_v21 = vpop.f32.mrb[30].mxu1 }
 0x527   : > { %v1805_v34 = vpop.f32.mrb[31].mxu0  ;;  %v2455_v37 = vpop.f32.mrb[31].mxu1 }
 0x534   : > { %v2028_v62 = vpop.f32.mrb[32].mxu1 }
 0x535   : > { %v2036_v6 = vadd.f32 %v2028_v62, %v1849_v48  ;;  %v1987_v14 = vpop.f32.mrb[32].mxu0  ;;  %v2460_v7 = vpop.f32.mrb[33].mxu1 }
 0x536   : > { %v2034_v52 = vadd.f32 %v1987_v14, %v1847_v33  ;;  %v1989_v4 = vpop.f32.mrb[33].mxu0  ;;  %v2031_v9 = vpop.f32.mrb[34].mxu1 }
 0x537   : > { %v2035_v5 = vadd.f32 %v1989_v4, %v1848_v22  ;;  %v1991_v55 = vpop.f32.mrb[34].mxu0  ;;  %v2461_v26 = vpop.f32.mrb[35].mxu1 }
 0x538   : > { %v1992_v2 = vpop.f32.mrb[35].mxu0 }
 0x53c   : > { %v2215_v28 = vpop.f32.mrb[36].mxu1 }
 0x53d   : > { %v2223_v50 = vadd.f32 %v2215_v28, %v2036_v6  ;;  %v2174_v36 = vpop.f32.mrb[36].mxu0  ;;  %v2466_v43 = vpop.f32.mrb[37].mxu1 }
 0x53e   : > { %v2221_v11 = vadd.f32 %v2174_v36, %v2034_v52  ;;  %v2176_v53 = vpop.f32.mrb[37].mxu0  ;;  %v2218_v45 = vpop.f32.mrb[38].mxu1 }
 0x53f   : > { %v2222_v41 = vadd.f32 %v2176_v53, %v2035_v5  ;;  %v2232_v25 = vadd.f32 %v2228_v8, %v2223_v50  ;;  %v2178_v51 = vpop.f32.mrb[38].mxu0  ;;  %v2467_v30 = vpop.f32.mrb[39].mxu1 }
 0x540   : > { %v2230_v10 = vadd.f32 %v2228_v8, %v2221_v11  ;;  %v2179_v57 = vpop.f32.mrb[39].mxu0 }
 0x541   : > { %v2231_v0 = vadd.f32 %v2228_v8, %v2222_v41  ;;  %2236 = vst.msk [vmem:[%s255_s17 + $0x10] sm:$0xff] %vm2235_vm1, %v2232_v25 }
 0x542   : > { %2233 = vst [vmem:[%s255_s17] sm:$0xff] %v2230_v10 }
 0x543   : > { %2234 = vst [vmem:[%s255_s17 + $0x8] sm:$0xff] %v2231_v0 }
 0x544   : > { %2635 = shalt.err (!%p2632_p3)
}
 0x545   : > { %s2636_s10 = scalar_lea.hbm %s3520_s25, 384  ;;  %s2640_s14 = scalar_lea.hbm %s3570_s6, 768 }
 0x546   : > { %p2637_p4 = scmp.ne.s32.totalorder %s3520_s25, %s2636_s10  ;;  %p2641_p9 = scmp.lt.u32.totalorder %s3520_s25, %s3570_s6 }
 0x547   : > { %p2642_p10 = scmp.lt.u32.totalorder %s2640_s14, %s2636_s10  ;;  %p2644_p12 = scmp.lt.u32.totalorder %s2636_s10, %s3520_s25 }
 0x548   : > { %p2638_p7 = pnand %p2637_p4, %p2780_p5 }
 0x549   : > { %p2643_p11 = por %p2642_p10, %p2641_p9 }
 0x54a   : > { %p2639_p8 = pneg %p2638_p7 }
 0x54b   : > { %p2645_p13 = por %p2644_p12, %p2643_p11 }
 0x54d   : > { %p2646_p0 = pnand %p2645_p13, %p2639_p8 }
 0x54f   : > { %2649 = shalt.err (!%p2646_p0)
}
 0x550   : > { %2479 = dma.vmem_to_hbm [thread:$0]  (%p2780_p5), %s3522_s18, 384, %s3520_s25, %s2238_s20  }
 0x551 PF: > { %p2485_p1 = scmp.ge.s32.totalorder %s2684_s24, 2  ;;  %s2264_s17 = sand.u32 1, %s2672_s21  }
 0x552   : > { %s2265_s13 = scalar_lea.sflag [#allocation3], %s2264_s17 }
 0x553   : > { %p2482_p2 = pnand %p2485_p1, %p2784_p6 }
 0x555   : > { %2667 = dma.done.wait (!%p2482_p2), %s2265_s13, 384  }
 0x556   : > { %2669 = vsyncadd (!%p2482_p2), %s2265_s13, 4294966912  ;;  %p16_p3 = scmp.ge.s32.totalorder %s2767_s27, 4   ;;  %s3573_s21 = smov %s2676_s22 }
 0x557   : > { %s3574_s22 = smov %s2680_s23  ;;  %s3575_s23 = smov %s2778_s30 }
 0x558   : > { %s3576_s24 = smov %s2767_s27  ;;  %18 = sbr.rel (!%p16_p3) target bundleno = 3 (0x3), region = 82 }
 0x55f   :  { %2270 = vsyncpa [#allocation3], 1 }
 0x560   :  { %2272 = vsyncpa [#allocation3 + $0x1], 1 }

</bundles_post_ra>
